<compile_context>
chip_gen: v7x
topology: tpu7x:2x2x1
jax: 0.10.0
libtpu: 0.0.40
codegen_flags: <defaults>
</compile_context>

<pallas_src>
import math

import jax
import jax.numpy as jnp
from jax import lax
from jax.experimental import pallas as pl
from jax.experimental.pallas import tpu as pltpu

EPS = 1e-6
_VMEM_LIMIT = 48 * 1024 * 1024  # leave headroom under v7x's 64 MiB VMEM


# ----------------------------------------------------------------------------
# Norm helpers (torch: alpha * (x - mean) / (std + eps) + bias, unbiased std)
# ----------------------------------------------------------------------------
def _norm_ref(x, alpha, bias, eps=EPS):
    d = x.shape[-1]
    mean = jnp.mean(x, axis=-1, keepdims=True)
    c = x - mean
    var = jnp.sum(c * c, axis=-1, keepdims=True) / (d - 1)
    return alpha * c / (jnp.sqrt(var) + eps) + bias


def _norm_in_kernel(x, alpha, bias, eps=EPS):
    d = x.shape[-1]
    mean = jnp.mean(x, axis=-1, keepdims=True)
    c = x - mean
    var = jnp.sum(c * c, axis=-1, keepdims=True) * (1.0 / (d - 1))
    inv = pl.reciprocal(jnp.sqrt(var) + eps, approx=True)   # EUP, off the VALU path
    return alpha * c * inv + bias


# ----------------------------------------------------------------------------
# Pallas kernels
# ----------------------------------------------------------------------------
def make_encoder_layer_kernel(n_heads, head_dim, fuse_final_norm):
    inv_scale = 1.0 / math.sqrt(head_dim)

    def layer_body(src_ref, mask_ref, a1_ref, bn1_ref, wqkv_ref, bqkv_ref,
                   wo_ref, bo_ref, a2_ref, bn2_ref, w1_ref, fb1_ref,
                   w2_ref, fb2_ref):
        x = src_ref[...]                       # (S, D) f32
        m = mask_ref[...]                      # (1, S) f32
        S, D = x.shape

        # --- self-attention sub-layer (pre-norm) ---
        xn = _norm_in_kernel(x, a1_ref[...], bn1_ref[...])
        xn_bf = xn.astype(jnp.bfloat16)
        # fused QKV projection: one (S,D) @ (D,3D) MXU op
        qkv = jnp.dot(xn_bf, wqkv_ref[...],
                      preferred_element_type=jnp.float32) + bqkv_ref[...]
        # fold 1/sqrt(head_dim) into q instead of dividing (S,S) scores
        q = (qkv[:, :D] * inv_scale).astype(jnp.bfloat16)
        k = qkv[:, D:2 * D].astype(jnp.bfloat16)
        v = qkv[:, 2 * D:].astype(jnp.bfloat16)

        # additive mask bias, computed once (not per head)
        mbias = jnp.where(m == 0.0, jnp.float32(-1e10), jnp.float32(0.0))

        wo = wo_ref[...]                       # (D, D) bf16
        acc = jnp.zeros((S, D), jnp.float32)   # attention output, Wo fused in
        for h in range(n_heads):               # static unroll over heads
            lo = h * head_dim
            qh = q[:, lo:lo + head_dim]
            kh = k[:, lo:lo + head_dim]
            vh = v[:, lo:lo + head_dim]
            # q @ k^T without materializing the transpose
            e = lax.dot_general(qh, kh, (((1,), (1,)), ((), ())),
                                preferred_element_type=jnp.float32)
            e = e + mbias
            e_max = jnp.max(e, axis=-1, keepdims=True)
            p = jnp.exp(e - e_max)
            p = p * pl.reciprocal(jnp.sum(p, axis=-1, keepdims=True), approx=True)
            ho = jnp.dot(p.astype(jnp.bfloat16), vh,
                         preferred_element_type=jnp.float32)
            # accumulate directly into the output projection (no concatenate)
            acc = acc + jnp.dot(ho.astype(jnp.bfloat16), wo[lo:lo + head_dim, :],
                                preferred_element_type=jnp.float32)
        x = x + acc + bo_ref[...]              # residual (dropout = identity)

        # --- position-wise feed-forward sub-layer (pre-norm) ---
        xn2 = _norm_in_kernel(x, a2_ref[...], bn2_ref[...]).astype(jnp.bfloat16)
        h1 = jnp.maximum(
            jnp.dot(xn2, w1_ref[...], preferred_element_type=jnp.float32)
            + fb1_ref[...], 0.0)
        ff = jnp.dot(h1.astype(jnp.bfloat16), w2_ref[...],
                     preferred_element_type=jnp.float32) + fb2_ref[...]
        return x + ff

    if fuse_final_norm:
        def kernel(src_ref, mask_ref, a1_ref, bn1_ref, wqkv_ref, bqkv_ref,
                   wo_ref, bo_ref, a2_ref, bn2_ref, w1_ref, fb1_ref,
                   w2_ref, fb2_ref, fa_ref, fbias_ref, out_ref):
            y = layer_body(src_ref, mask_ref, a1_ref, bn1_ref, wqkv_ref,
                           bqkv_ref, wo_ref, bo_ref, a2_ref, bn2_ref,
                           w1_ref, fb1_ref, w2_ref, fb2_ref)
            out_ref[...] = _norm_in_kernel(y, fa_ref[...], fbias_ref[...])
    else:
        def kernel(src_ref, mask_ref, a1_ref, bn1_ref, wqkv_ref, bqkv_ref,
                   wo_ref, bo_ref, a2_ref, bn2_ref, w1_ref, fb1_ref,
                   w2_ref, fb2_ref, out_ref):
            out_ref[...] = layer_body(src_ref, mask_ref, a1_ref, bn1_ref,
                                      wqkv_ref, bqkv_ref, wo_ref, bo_ref,
                                      a2_ref, bn2_ref, w1_ref, fb1_ref,
                                      w2_ref, fb2_ref)

    return kernel


def _final_norm_kernel(src_ref, a_ref, b_ref, out_ref):
    out_ref[...] = _norm_in_kernel(src_ref[...], a_ref[...], b_ref[...])


# ----------------------------------------------------------------------------
# pallas_call wrappers
# ----------------------------------------------------------------------------
def encoder_layer_pallas(src, mask3, p, n_heads, final_norm=None):
    """One encoder layer; if final_norm=(alpha, bias), the Encoder's final
    Norm is fused into this kernel."""
    B, S, D = src.shape
    head_dim = D // n_heads
    fuse = final_norm is not None
    kernel = make_encoder_layer_kernel(n_heads, head_dim, fuse)

    # Fuse Q/K/V weights into one (D, 3D) matrix; cast matmul weights to bf16
    # (activations are cast at the matmul inputs, accumulation stays f32).
    wqkv = jnp.concatenate([p["wq"], p["wk"], p["wv"]], axis=1).astype(jnp.bfloat16)
    bqkv = jnp.concatenate([p["bq"], p["bk"], p["bv"]], axis=1)
    wo = p["wo"].astype(jnp.bfloat16)
    w1 = p["w1"].astype(jnp.bfloat16)
    w2 = p["w2"].astype(jnp.bfloat16)

    # Replicated parameters: whole-array VMEM residents (no per-grid-step
    # double buffering of weights that never change across the batch grid).
    def weight_spec():
        return pl.BlockSpec(memory_space=pltpu.MemorySpace.VMEM)

    n_weights = 12 + (2 if fuse else 0)
    in_specs = ([pl.BlockSpec((None, S, D), lambda b: (b, 0, 0)),   # src  -> (S, D)
                 pl.BlockSpec((None, 1, S), lambda b: (b, 0, 0))]   # mask -> (1, S)
                + [weight_spec() for _ in range(n_weights)])

    args = [src, mask3,
            p["a1"], p["bn1"], wqkv, bqkv, wo, p["bo"],
            p["a2"], p["bn2"], w1, p["fb1"], w2, p["fb2"]]
    if fuse:
        args += [final_norm[0], final_norm[1]]

    return pl.pallas_call(
        kernel,
        out_shape=jax.ShapeDtypeStruct((B, S, D), jnp.float32),
        grid=(B,),
        in_specs=in_specs,
        out_specs=pl.BlockSpec((None, S, D), lambda b: (b, 0, 0)),
        compiler_params=pltpu.CompilerParams(
            dimension_semantics=("parallel",),
            vmem_limit_bytes=_VMEM_LIMIT),
    )(*args)


def final_norm_pallas(src, alpha, bias):
    """Standalone final Norm (only used when there are no encoder layers)."""
    B, S, D = src.shape
    return pl.pallas_call(
        _final_norm_kernel,
        out_shape=jax.ShapeDtypeStruct((B, S, D), jnp.float32),
        grid=(B,),
        in_specs=[pl.BlockSpec((None, S, D), lambda b: (b, 0, 0)),
                  pl.BlockSpec(memory_space=pltpu.MemorySpace.VMEM),
                  pl.BlockSpec(memory_space=pltpu.MemorySpace.VMEM)],
        out_specs=pl.BlockSpec((None, S, D), lambda b: (b, 0, 0)),
        compiler_params=pltpu.CompilerParams(
            dimension_semantics=("parallel",),
            vmem_limit_bytes=_VMEM_LIMIT),
    )(src, alpha, bias)


def encoder_forward(params, src_tokens, src_mask, n_heads):
    """Pallas-backed Encoder.forward (dropout = identity)."""
    B, S = src_tokens.shape
    D = params["tok_emb"].shape[1]
    # Embedding lookups are glue (gather) in plain JAX.
    tok = params["tok_emb"][src_tokens]                      # (B, S, D)
    pos = params["pos_emb"][jnp.arange(S)][None, :, :]       # (1, S, D)
    x = tok * jnp.sqrt(jnp.float32(D)) + pos                 # tok*scale + pos
    mask3 = src_mask.astype(jnp.float32).reshape(B, 1, S)

    n_layers = len(params["layers"])
    if n_layers == 0:
        return final_norm_pallas(x, params["norm_a"], params["norm_b"])
    for i, layer_p in enumerate(params["layers"]):
        fuse = ((params["norm_a"], params["norm_b"])
                if i == n_layers - 1 else None)
        x = encoder_layer_pallas(x, mask3, layer_p, n_heads, final_norm=fuse)
    return x


# ----------------------------------------------------------------------------
# Pure-JAX reference (for correctness check; f32 throughout)
# ----------------------------------------------------------------------------
def ref_forward(params, src_tokens, src_mask, n_heads):
    B, S = src_tokens.shape
    D = params["tok_emb"].shape[1]
    Hd = D // n_heads
    tok = params["tok_emb"][src_tokens]
    pos = params["pos_emb"][jnp.arange(S)][None, :, :]
    x = tok * jnp.sqrt(jnp.float32(D)) + pos
    m = src_mask.astype(jnp.float32)[:, None, None, :]       # (B,1,1,S)
    for p in params["layers"]:
        xn = _norm_ref(x, p["a1"], p["bn1"])
        q = (xn @ p["wq"] + p["bq"]).reshape(B, S, n_heads, Hd).transpose(0, 2, 1, 3)
        k = (xn @ p["wk"] + p["bk"]).reshape(B, S, n_heads, Hd).transpose(0, 2, 1, 3)
        v = (xn @ p["wv"] + p["bv"]).reshape(B, S, n_heads, Hd).transpose(0, 2, 1, 3)
        e = jnp.einsum("bhqd,bhkd->bhqk", q, k) / math.sqrt(Hd)
        e = jnp.where(m == 0.0, jnp.float32(-1e10), e)
        a = jax.nn.softmax(e, axis=-1)
        o = jnp.einsum("bhqk,bhkd->bhqd", a, v).transpose(0, 2, 1, 3).reshape(B, S, D)
        x = x + (o @ p["wo"] + p["bo"])
        xn = _norm_ref(x, p["a2"], p["bn2"])
        ff = jnp.maximum(xn @ p["w1"] + p["fb1"], 0.0) @ p["w2"] + p["fb2"]
        x = x + ff
    return _norm_ref(x, params["norm_a"], params["norm_b"])


# ----------------------------------------------------------------------------
# Deterministic parameter init
# ----------------------------------------------------------------------------
def init_params(key, vocab, max_len, hid_dim, n_layers, n_heads, pf_dim):
    # 2 top-level + 12 per-layer random tensors; allocate with headroom.
    ks = iter(jax.random.split(key, 8 + n_layers * 16))

    def rnd(shape, scale=0.05):
        return (scale * jax.random.normal(next(ks), shape)).astype(jnp.float32)

    params = {
        "tok_emb": rnd((vocab, hid_dim), 0.1),
        "pos_emb": rnd((max_len, hid_dim), 0.1),
        "norm_a": jnp.ones((1, hid_dim), jnp.float32),
        "norm_b": jnp.zeros((1, hid_dim), jnp.float32),
        "layers": [],
    }
    for _ in range(n_layers):
        layer = {
            "a1": jnp.ones((1, hid_dim), jnp.float32),
            "bn1": jnp.zeros((1, hid_dim), jnp.float32),
            "wq": rnd((hid_dim, hid_dim)), "bq": rnd((1, hid_dim)),
            "wk": rnd((hid_dim, hid_dim)), "bk": rnd((1, hid_dim)),
            "wv": rnd((hid_dim, hid_dim)), "bv": rnd((1, hid_dim)),
            "wo": rnd((hid_dim, hid_dim)), "bo": rnd((1, hid_dim)),
            "a2": jnp.ones((1, hid_dim), jnp.float32),
            "bn2": jnp.zeros((1, hid_dim), jnp.float32),
            "w1": rnd((hid_dim, pf_dim)), "fb1": rnd((1, pf_dim)),
            "w2": rnd((pf_dim, hid_dim)), "fb2": rnd((1, hid_dim)),
        }
        params["layers"].append(layer)
    return params


if __name__ == "__main__":
    B, S = 2, 8
    HID, N_LAYERS, N_HEADS, PF = 128, 2, 4, 256   # D and PF lane-dense (×128)
    VOCAB, MAX_LEN = 50, 16

    key = jax.random.PRNGKey(0)
    k_param, k_tok = jax.random.split(key)
    params = init_params(k_param, VOCAB, MAX_LEN, HID, N_LAYERS, N_HEADS, PF)

    src_tokens = jax.random.randint(k_tok, (B, S), 0, VOCAB, dtype=jnp.int32)
    src_mask = jnp.ones((B, S), jnp.float32).at[1, -2:].set(0.0)  # pad last 2 of batch 1

    out = jax.block_until_ready(encoder_forward(params, src_tokens, src_mask, N_HEADS))
    ref = jax.block_until_ready(ref_forward(params, src_tokens, src_mask, N_HEADS))

    assert out.shape == (B, S, HID)
    max_err = float(jnp.max(jnp.abs(out - ref)))
    # bf16 matmul inputs + approx reciprocal -> slightly looser tolerance.
    assert jnp.allclose(out, ref, atol=2e-2, rtol=2e-2), f"max abs err {max_err}"

    print("KERNEL_OK")
</pallas_src>

<mosaic_0001>
module attributes {stable_mosaic.version = 11 : i64} {
  func.func @kernel(%arg0: i32, %arg1: memref<1x8x128xf32, #tpu.memory_space<vmem>>, %arg2: memref<1x1x8xf32, #tpu.memory_space<vmem>>, %arg3: memref<1x128xf32, #tpu.memory_space<vmem>>, %arg4: memref<1x128xf32, #tpu.memory_space<vmem>>, %arg5: memref<128x384xbf16, #tpu.memory_space<vmem>>, %arg6: memref<1x384xf32, #tpu.memory_space<vmem>>, %arg7: memref<128x128xbf16, #tpu.memory_space<vmem>>, %arg8: memref<1x128xf32, #tpu.memory_space<vmem>>, %arg9: memref<1x128xf32, #tpu.memory_space<vmem>>, %arg10: memref<1x128xf32, #tpu.memory_space<vmem>>, %arg11: memref<128x256xbf16, #tpu.memory_space<vmem>>, %arg12: memref<1x256xf32, #tpu.memory_space<vmem>>, %arg13: memref<256x128xbf16, #tpu.memory_space<vmem>>, %arg14: memref<1x128xf32, #tpu.memory_space<vmem>>, %arg15: memref<1x8x128xf32, #tpu.memory_space<vmem>>) attributes {dimension_semantics = [#tpu.dimension_semantics<parallel>], iteration_bounds = array<i64: 2>, scalar_prefetch = 0 : i64, scratch_operands = 0 : i64, tpu.core_type = #tpu.core_type<tc>, window_params = [{transform_indices = @transform_0, window_bounds = array<i64: 1, 8, 128>}, {transform_indices = @transform_1, window_bounds = array<i64: 1, 1, 8>}, {pipeline_mode = #tpu.pipeline_mode<synchronous>, transform_indices = @transform_2, window_bounds = array<i64: 1, 128>}, {pipeline_mode = #tpu.pipeline_mode<synchronous>, transform_indices = @transform_3, window_bounds = array<i64: 1, 128>}, {pipeline_mode = #tpu.pipeline_mode<synchronous>, transform_indices = @transform_4, window_bounds = array<i64: 128, 384>}, {pipeline_mode = #tpu.pipeline_mode<synchronous>, transform_indices = @transform_5, window_bounds = array<i64: 1, 384>}, {pipeline_mode = #tpu.pipeline_mode<synchronous>, transform_indices = @transform_6, window_bounds = array<i64: 128, 128>}, {pipeline_mode = #tpu.pipeline_mode<synchronous>, transform_indices = @transform_7, window_bounds = array<i64: 1, 128>}, {pipeline_mode = #tpu.pipeline_mode<synchronous>, transform_indices = @transform_8, window_bounds = array<i64: 1, 128>}, {pipeline_mode = #tpu.pipeline_mode<synchronous>, transform_indices = @transform_9, window_bounds = array<i64: 1, 128>}, {pipeline_mode = #tpu.pipeline_mode<synchronous>, transform_indices = @transform_10, window_bounds = array<i64: 128, 256>}, {pipeline_mode = #tpu.pipeline_mode<synchronous>, transform_indices = @transform_11, window_bounds = array<i64: 1, 256>}, {pipeline_mode = #tpu.pipeline_mode<synchronous>, transform_indices = @transform_12, window_bounds = array<i64: 256, 128>}, {pipeline_mode = #tpu.pipeline_mode<synchronous>, transform_indices = @transform_13, window_bounds = array<i64: 1, 128>}, {transform_indices = @transform_14, window_bounds = array<i64: 1, 8, 128>}]} {
    %c0 = arith.constant 0 : index
    %c0_0 = arith.constant 0 : index
    %c0_1 = arith.constant 0 : index
    %0 = vector.load %arg1[%c0, %c0_0, %c0_1] : memref<1x8x128xf32, #tpu.memory_space<vmem>>, vector<1x8x128xf32>
    %1 = vector.shape_cast %0 : vector<1x8x128xf32> to vector<8x128xf32>
    %c0_2 = arith.constant 0 : index
    %c0_3 = arith.constant 0 : index
    %c0_4 = arith.constant 0 : index
    %2 = vector.load %arg2[%c0_2, %c0_3, %c0_4] : memref<1x1x8xf32, #tpu.memory_space<vmem>>, vector<1x1x8xf32>
    %3 = vector.shape_cast %2 : vector<1x1x8xf32> to vector<1x8xf32>
    %c0_5 = arith.constant 0 : index
    %c0_6 = arith.constant 0 : index
    %4 = vector.load %arg3[%c0_5, %c0_6] : memref<1x128xf32, #tpu.memory_space<vmem>>, vector<1x128xf32>
    %c0_7 = arith.constant 0 : index
    %c0_8 = arith.constant 0 : index
    %5 = vector.load %arg4[%c0_7, %c0_8] : memref<1x128xf32, #tpu.memory_space<vmem>>, vector<1x128xf32>
    %cst = arith.constant dense<0.000000e+00> : vector<8xf32>
    %6 = vector.multi_reduction <add>, %1, %cst [1] : vector<8x128xf32> to vector<8xf32>
    %7 = vector.shape_cast %6 : vector<8xf32> to vector<8x1xf32>
    %cst_9 = arith.constant 1.280000e+02 : f32
    %8 = vector.broadcast %cst_9 : f32 to vector<8x1xf32>
    %9 = arith.divf %7, %8 : vector<8x1xf32>
    %10 = vector.broadcast %9 : vector<8x1xf32> to vector<8x128xf32>
    %11 = arith.subf %1, %10 : vector<8x128xf32>
    %12 = arith.mulf %11, %11 : vector<8x128xf32>
    %cst_10 = arith.constant dense<0.000000e+00> : vector<8xf32>
    %13 = vector.multi_reduction <add>, %12, %cst_10 [1] : vector<8x128xf32> to vector<8xf32>
    %14 = vector.shape_cast %13 : vector<8xf32> to vector<8x1xf32>
    %cst_11 = arith.constant 0.00787401571 : f32
    %15 = vector.broadcast %cst_11 : f32 to vector<8x1xf32>
    %16 = arith.mulf %14, %15 : vector<8x1xf32>
    %17 = math.sqrt %16 : vector<8x1xf32>
    %cst_12 = arith.constant 9.99999997E-7 : f32
    %18 = vector.broadcast %cst_12 : f32 to vector<8x1xf32>
    %19 = arith.addf %17, %18 : vector<8x1xf32>
    %20 = tpu.reciprocal %19 {approx = true} : vector<8x1xf32> -> vector<8x1xf32>
    %21 = vector.broadcast %4 : vector<1x128xf32> to vector<8x128xf32>
    %22 = arith.mulf %21, %11 : vector<8x128xf32>
    %23 = vector.broadcast %20 : vector<8x1xf32> to vector<8x128xf32>
    %24 = arith.mulf %22, %23 : vector<8x128xf32>
    %25 = vector.broadcast %5 : vector<1x128xf32> to vector<8x128xf32>
    %26 = arith.addf %24, %25 : vector<8x128xf32>
    %27 = arith.truncf %26 : vector<8x128xf32> to vector<8x128xbf16>
    %c0_13 = arith.constant 0 : index
    %c0_14 = arith.constant 0 : index
    %28 = vector.load %arg5[%c0_13, %c0_14] : memref<128x384xbf16, #tpu.memory_space<vmem>>, vector<128x384xbf16>
    %cst_15 = arith.constant dense<0.000000e+00> : vector<8x384xf32>
    %29 = tpu.matmul %27, %28, %cst_15 {dimension_numbers = #tpu.dot_dimension_numbers<[1], [0], [0], [1], [0, 0, 1, 1], [], []>} : vector<8x128xbf16>, vector<128x384xbf16>, vector<8x384xf32> -> vector<8x384xf32>
    %c0_16 = arith.constant 0 : index
    %c0_17 = arith.constant 0 : index
    %30 = vector.load %arg6[%c0_16, %c0_17] : memref<1x384xf32, #tpu.memory_space<vmem>>, vector<1x384xf32>
    %31 = vector.broadcast %30 : vector<1x384xf32> to vector<8x384xf32>
    %32 = arith.addf %29, %31 : vector<8x384xf32>
    %33 = vector.extract_strided_slice %32 {offsets = [0, 0], sizes = [8, 128], strides = [1, 1]} : vector<8x384xf32> to vector<8x128xf32>
    %cst_18 = arith.constant 0.176776692 : f32
    %34 = vector.broadcast %cst_18 : f32 to vector<8x128xf32>
    %35 = arith.mulf %33, %34 : vector<8x128xf32>
    %36 = arith.truncf %35 : vector<8x128xf32> to vector<8x128xbf16>
    %37 = vector.extract_strided_slice %32 {offsets = [0, 128], sizes = [8, 128], strides = [1, 1]} : vector<8x384xf32> to vector<8x128xf32>
    %38 = arith.truncf %37 : vector<8x128xf32> to vector<8x128xbf16>
    %39 = vector.extract_strided_slice %32 {offsets = [0, 256], sizes = [8, 128], strides = [1, 1]} : vector<8x384xf32> to vector<8x128xf32>
    %40 = arith.truncf %39 : vector<8x128xf32> to vector<8x128xbf16>
    %cst_19 = arith.constant 0.000000e+00 : f32
    %41 = vector.broadcast %cst_19 : f32 to vector<1x8xf32>
    %42 = arith.cmpf oeq, %3, %41 : vector<1x8xf32>
    %cst_20 = arith.constant -1.000000e+10 : f32
    %cst_21 = arith.constant 0.000000e+00 : f32
    %43 = vector.broadcast %cst_20 : f32 to vector<1x8xf32>
    %44 = vector.broadcast %cst_21 : f32 to vector<1x8xf32>
    %45 = arith.select %42, %43, %44 : vector<1x8xi1>, vector<1x8xf32>
    %c0_22 = arith.constant 0 : index
    %c0_23 = arith.constant 0 : index
    %46 = vector.load %arg7[%c0_22, %c0_23] : memref<128x128xbf16, #tpu.memory_space<vmem>>, vector<128x128xbf16>
    %cst_24 = arith.constant 0.000000e+00 : f32
    %47 = vector.broadcast %cst_24 : f32 to vector<8x128xf32>
    %48 = vector.extract_strided_slice %36 {offsets = [0, 0], sizes = [8, 32], strides = [1, 1]} : vector<8x128xbf16> to vector<8x32xbf16>
    %49 = vector.extract_strided_slice %38 {offsets = [0, 0], sizes = [8, 32], strides = [1, 1]} : vector<8x128xbf16> to vector<8x32xbf16>
    %50 = vector.extract_strided_slice %40 {offsets = [0, 0], sizes = [8, 32], strides = [1, 1]} : vector<8x128xbf16> to vector<8x32xbf16>
    %cst_25 = arith.constant dense<0.000000e+00> : vector<8x8xf32>
    %51 = tpu.matmul %48, %49, %cst_25 {dimension_numbers = #tpu.dot_dimension_numbers<[1], [1], [0], [0], [0, 0, 1, 0], [], []>} : vector<8x32xbf16>, vector<8x32xbf16>, vector<8x8xf32> -> vector<8x8xf32>
    %52 = vector.broadcast %45 : vector<1x8xf32> to vector<8x8xf32>
    %53 = arith.addf %51, %52 : vector<8x8xf32>
    %cst_26 = arith.constant dense<0xFF800000> : vector<8xf32>
    %54 = vector.multi_reduction <maximumf>, %53, %cst_26 [1] : vector<8x8xf32> to vector<8xf32>
    %55 = vector.shape_cast %54 : vector<8xf32> to vector<8x1xf32>
    %56 = vector.broadcast %55 : vector<8x1xf32> to vector<8x8xf32>
    %57 = arith.subf %53, %56 : vector<8x8xf32>
    %58 = math.exp %57 : vector<8x8xf32>
    %cst_27 = arith.constant dense<0.000000e+00> : vector<8xf32>
    %59 = vector.multi_reduction <add>, %58, %cst_27 [1] : vector<8x8xf32> to vector<8xf32>
    %60 = vector.shape_cast %59 : vector<8xf32> to vector<8x1xf32>
    %61 = tpu.reciprocal %60 {approx = true} : vector<8x1xf32> -> vector<8x1xf32>
    %62 = vector.broadcast %61 : vector<8x1xf32> to vector<8x8xf32>
    %63 = arith.mulf %58, %62 : vector<8x8xf32>
    %64 = arith.truncf %63 : vector<8x8xf32> to vector<8x8xbf16>
    %cst_28 = arith.constant dense<0.000000e+00> : vector<8x32xf32>
    %65 = tpu.matmul %64, %50, %cst_28 {dimension_numbers = #tpu.dot_dimension_numbers<[1], [0], [0], [1], [0, 0, 1, 1], [], []>} : vector<8x8xbf16>, vector<8x32xbf16>, vector<8x32xf32> -> vector<8x32xf32>
    %66 = arith.truncf %65 : vector<8x32xf32> to vector<8x32xbf16>
    %67 = vector.extract_strided_slice %46 {offsets = [0, 0], sizes = [32, 128], strides = [1, 1]} : vector<128x128xbf16> to vector<32x128xbf16>
    %cst_29 = arith.constant dense<0.000000e+00> : vector<8x128xf32>
    %68 = tpu.matmul %66, %67, %cst_29 {dimension_numbers = #tpu.dot_dimension_numbers<[1], [0], [0], [1], [0, 0, 1, 1], [], []>} : vector<8x32xbf16>, vector<32x128xbf16>, vector<8x128xf32> -> vector<8x128xf32>
    %69 = arith.addf %47, %68 : vector<8x128xf32>
    %70 = vector.extract_strided_slice %36 {offsets = [0, 32], sizes = [8, 32], strides = [1, 1]} : vector<8x128xbf16> to vector<8x32xbf16>
    %71 = vector.extract_strided_slice %38 {offsets = [0, 32], sizes = [8, 32], strides = [1, 1]} : vector<8x128xbf16> to vector<8x32xbf16>
    %72 = vector.extract_strided_slice %40 {offsets = [0, 32], sizes = [8, 32], strides = [1, 1]} : vector<8x128xbf16> to vector<8x32xbf16>
    %cst_30 = arith.constant dense<0.000000e+00> : vector<8x8xf32>
    %73 = tpu.matmul %70, %71, %cst_30 {dimension_numbers = #tpu.dot_dimension_numbers<[1], [1], [0], [0], [0, 0, 1, 0], [], []>} : vector<8x32xbf16>, vector<8x32xbf16>, vector<8x8xf32> -> vector<8x8xf32>
    %74 = vector.broadcast %45 : vector<1x8xf32> to vector<8x8xf32>
    %75 = arith.addf %73, %74 : vector<8x8xf32>
    %cst_31 = arith.constant dense<0xFF800000> : vector<8xf32>
    %76 = vector.multi_reduction <maximumf>, %75, %cst_31 [1] : vector<8x8xf32> to vector<8xf32>
    %77 = vector.shape_cast %76 : vector<8xf32> to vector<8x1xf32>
    %78 = vector.broadcast %77 : vector<8x1xf32> to vector<8x8xf32>
    %79 = arith.subf %75, %78 : vector<8x8xf32>
    %80 = math.exp %79 : vector<8x8xf32>
    %cst_32 = arith.constant dense<0.000000e+00> : vector<8xf32>
    %81 = vector.multi_reduction <add>, %80, %cst_32 [1] : vector<8x8xf32> to vector<8xf32>
    %82 = vector.shape_cast %81 : vector<8xf32> to vector<8x1xf32>
    %83 = tpu.reciprocal %82 {approx = true} : vector<8x1xf32> -> vector<8x1xf32>
    %84 = vector.broadcast %83 : vector<8x1xf32> to vector<8x8xf32>
    %85 = arith.mulf %80, %84 : vector<8x8xf32>
    %86 = arith.truncf %85 : vector<8x8xf32> to vector<8x8xbf16>
    %cst_33 = arith.constant dense<0.000000e+00> : vector<8x32xf32>
    %87 = tpu.matmul %86, %72, %cst_33 {dimension_numbers = #tpu.dot_dimension_numbers<[1], [0], [0], [1], [0, 0, 1, 1], [], []>} : vector<8x8xbf16>, vector<8x32xbf16>, vector<8x32xf32> -> vector<8x32xf32>
    %88 = arith.truncf %87 : vector<8x32xf32> to vector<8x32xbf16>
    %89 = vector.extract_strided_slice %46 {offsets = [32, 0], sizes = [32, 128], strides = [1, 1]} : vector<128x128xbf16> to vector<32x128xbf16>
    %cst_34 = arith.constant dense<0.000000e+00> : vector<8x128xf32>
    %90 = tpu.matmul %88, %89, %cst_34 {dimension_numbers = #tpu.dot_dimension_numbers<[1], [0], [0], [1], [0, 0, 1, 1], [], []>} : vector<8x32xbf16>, vector<32x128xbf16>, vector<8x128xf32> -> vector<8x128xf32>
    %91 = arith.addf %69, %90 : vector<8x128xf32>
    %92 = vector.extract_strided_slice %36 {offsets = [0, 64], sizes = [8, 32], strides = [1, 1]} : vector<8x128xbf16> to vector<8x32xbf16>
    %93 = vector.extract_strided_slice %38 {offsets = [0, 64], sizes = [8, 32], strides = [1, 1]} : vector<8x128xbf16> to vector<8x32xbf16>
    %94 = vector.extract_strided_slice %40 {offsets = [0, 64], sizes = [8, 32], strides = [1, 1]} : vector<8x128xbf16> to vector<8x32xbf16>
    %cst_35 = arith.constant dense<0.000000e+00> : vector<8x8xf32>
    %95 = tpu.matmul %92, %93, %cst_35 {dimension_numbers = #tpu.dot_dimension_numbers<[1], [1], [0], [0], [0, 0, 1, 0], [], []>} : vector<8x32xbf16>, vector<8x32xbf16>, vector<8x8xf32> -> vector<8x8xf32>
    %96 = vector.broadcast %45 : vector<1x8xf32> to vector<8x8xf32>
    %97 = arith.addf %95, %96 : vector<8x8xf32>
    %cst_36 = arith.constant dense<0xFF800000> : vector<8xf32>
    %98 = vector.multi_reduction <maximumf>, %97, %cst_36 [1] : vector<8x8xf32> to vector<8xf32>
    %99 = vector.shape_cast %98 : vector<8xf32> to vector<8x1xf32>
    %100 = vector.broadcast %99 : vector<8x1xf32> to vector<8x8xf32>
    %101 = arith.subf %97, %100 : vector<8x8xf32>
    %102 = math.exp %101 : vector<8x8xf32>
    %cst_37 = arith.constant dense<0.000000e+00> : vector<8xf32>
    %103 = vector.multi_reduction <add>, %102, %cst_37 [1] : vector<8x8xf32> to vector<8xf32>
    %104 = vector.shape_cast %103 : vector<8xf32> to vector<8x1xf32>
    %105 = tpu.reciprocal %104 {approx = true} : vector<8x1xf32> -> vector<8x1xf32>
    %106 = vector.broadcast %105 : vector<8x1xf32> to vector<8x8xf32>
    %107 = arith.mulf %102, %106 : vector<8x8xf32>
    %108 = arith.truncf %107 : vector<8x8xf32> to vector<8x8xbf16>
    %cst_38 = arith.constant dense<0.000000e+00> : vector<8x32xf32>
    %109 = tpu.matmul %108, %94, %cst_38 {dimension_numbers = #tpu.dot_dimension_numbers<[1], [0], [0], [1], [0, 0, 1, 1], [], []>} : vector<8x8xbf16>, vector<8x32xbf16>, vector<8x32xf32> -> vector<8x32xf32>
    %110 = arith.truncf %109 : vector<8x32xf32> to vector<8x32xbf16>
    %111 = vector.extract_strided_slice %46 {offsets = [64, 0], sizes = [32, 128], strides = [1, 1]} : vector<128x128xbf16> to vector<32x128xbf16>
    %cst_39 = arith.constant dense<0.000000e+00> : vector<8x128xf32>
    %112 = tpu.matmul %110, %111, %cst_39 {dimension_numbers = #tpu.dot_dimension_numbers<[1], [0], [0], [1], [0, 0, 1, 1], [], []>} : vector<8x32xbf16>, vector<32x128xbf16>, vector<8x128xf32> -> vector<8x128xf32>
    %113 = arith.addf %91, %112 : vector<8x128xf32>
    %114 = vector.extract_strided_slice %36 {offsets = [0, 96], sizes = [8, 32], strides = [1, 1]} : vector<8x128xbf16> to vector<8x32xbf16>
    %115 = vector.extract_strided_slice %38 {offsets = [0, 96], sizes = [8, 32], strides = [1, 1]} : vector<8x128xbf16> to vector<8x32xbf16>
    %116 = vector.extract_strided_slice %40 {offsets = [0, 96], sizes = [8, 32], strides = [1, 1]} : vector<8x128xbf16> to vector<8x32xbf16>
    %cst_40 = arith.constant dense<0.000000e+00> : vector<8x8xf32>
    %117 = tpu.matmul %114, %115, %cst_40 {dimension_numbers = #tpu.dot_dimension_numbers<[1], [1], [0], [0], [0, 0, 1, 0], [], []>} : vector<8x32xbf16>, vector<8x32xbf16>, vector<8x8xf32> -> vector<8x8xf32>
    %118 = vector.broadcast %45 : vector<1x8xf32> to vector<8x8xf32>
    %119 = arith.addf %117, %118 : vector<8x8xf32>
    %cst_41 = arith.constant dense<0xFF800000> : vector<8xf32>
    %120 = vector.multi_reduction <maximumf>, %119, %cst_41 [1] : vector<8x8xf32> to vector<8xf32>
    %121 = vector.shape_cast %120 : vector<8xf32> to vector<8x1xf32>
    %122 = vector.broadcast %121 : vector<8x1xf32> to vector<8x8xf32>
    %123 = arith.subf %119, %122 : vector<8x8xf32>
    %124 = math.exp %123 : vector<8x8xf32>
    %cst_42 = arith.constant dense<0.000000e+00> : vector<8xf32>
    %125 = vector.multi_reduction <add>, %124, %cst_42 [1] : vector<8x8xf32> to vector<8xf32>
    %126 = vector.shape_cast %125 : vector<8xf32> to vector<8x1xf32>
    %127 = tpu.reciprocal %126 {approx = true} : vector<8x1xf32> -> vector<8x1xf32>
    %128 = vector.broadcast %127 : vector<8x1xf32> to vector<8x8xf32>
    %129 = arith.mulf %124, %128 : vector<8x8xf32>
    %130 = arith.truncf %129 : vector<8x8xf32> to vector<8x8xbf16>
    %cst_43 = arith.constant dense<0.000000e+00> : vector<8x32xf32>
    %131 = tpu.matmul %130, %116, %cst_43 {dimension_numbers = #tpu.dot_dimension_numbers<[1], [0], [0], [1], [0, 0, 1, 1], [], []>} : vector<8x8xbf16>, vector<8x32xbf16>, vector<8x32xf32> -> vector<8x32xf32>
    %132 = arith.truncf %131 : vector<8x32xf32> to vector<8x32xbf16>
    %133 = vector.extract_strided_slice %46 {offsets = [96, 0], sizes = [32, 128], strides = [1, 1]} : vector<128x128xbf16> to vector<32x128xbf16>
    %cst_44 = arith.constant dense<0.000000e+00> : vector<8x128xf32>
    %134 = tpu.matmul %132, %133, %cst_44 {dimension_numbers = #tpu.dot_dimension_numbers<[1], [0], [0], [1], [0, 0, 1, 1], [], []>} : vector<8x32xbf16>, vector<32x128xbf16>, vector<8x128xf32> -> vector<8x128xf32>
    %135 = arith.addf %113, %134 : vector<8x128xf32>
    %136 = arith.addf %1, %135 : vector<8x128xf32>
    %c0_45 = arith.constant 0 : index
    %c0_46 = arith.constant 0 : index
    %137 = vector.load %arg8[%c0_45, %c0_46] : memref<1x128xf32, #tpu.memory_space<vmem>>, vector<1x128xf32>
    %138 = vector.broadcast %137 : vector<1x128xf32> to vector<8x128xf32>
    %139 = arith.addf %136, %138 : vector<8x128xf32>
    %c0_47 = arith.constant 0 : index
    %c0_48 = arith.constant 0 : index
    %140 = vector.load %arg9[%c0_47, %c0_48] : memref<1x128xf32, #tpu.memory_space<vmem>>, vector<1x128xf32>
    %c0_49 = arith.constant 0 : index
    %c0_50 = arith.constant 0 : index
    %141 = vector.load %arg10[%c0_49, %c0_50] : memref<1x128xf32, #tpu.memory_space<vmem>>, vector<1x128xf32>
    %cst_51 = arith.constant dense<0.000000e+00> : vector<8xf32>
    %142 = vector.multi_reduction <add>, %139, %cst_51 [1] : vector<8x128xf32> to vector<8xf32>
    %143 = vector.shape_cast %142 : vector<8xf32> to vector<8x1xf32>
    %cst_52 = arith.constant 1.280000e+02 : f32
    %144 = vector.broadcast %cst_52 : f32 to vector<8x1xf32>
    %145 = arith.divf %143, %144 : vector<8x1xf32>
    %146 = vector.broadcast %145 : vector<8x1xf32> to vector<8x128xf32>
    %147 = arith.subf %139, %146 : vector<8x128xf32>
    %148 = arith.mulf %147, %147 : vector<8x128xf32>
    %cst_53 = arith.constant dense<0.000000e+00> : vector<8xf32>
    %149 = vector.multi_reduction <add>, %148, %cst_53 [1] : vector<8x128xf32> to vector<8xf32>
    %150 = vector.shape_cast %149 : vector<8xf32> to vector<8x1xf32>
    %cst_54 = arith.constant 0.00787401571 : f32
    %151 = vector.broadcast %cst_54 : f32 to vector<8x1xf32>
    %152 = arith.mulf %150, %151 : vector<8x1xf32>
    %153 = math.sqrt %152 : vector<8x1xf32>
    %cst_55 = arith.constant 9.99999997E-7 : f32
    %154 = vector.broadcast %cst_55 : f32 to vector<8x1xf32>
    %155 = arith.addf %153, %154 : vector<8x1xf32>
    %156 = tpu.reciprocal %155 {approx = true} : vector<8x1xf32> -> vector<8x1xf32>
    %157 = vector.broadcast %140 : vector<1x128xf32> to vector<8x128xf32>
    %158 = arith.mulf %157, %147 : vector<8x128xf32>
    %159 = vector.broadcast %156 : vector<8x1xf32> to vector<8x128xf32>
    %160 = arith.mulf %158, %159 : vector<8x128xf32>
    %161 = vector.broadcast %141 : vector<1x128xf32> to vector<8x128xf32>
    %162 = arith.addf %160, %161 : vector<8x128xf32>
    %163 = arith.truncf %162 : vector<8x128xf32> to vector<8x128xbf16>
    %c0_56 = arith.constant 0 : index
    %c0_57 = arith.constant 0 : index
    %164 = vector.load %arg11[%c0_56, %c0_57] : memref<128x256xbf16, #tpu.memory_space<vmem>>, vector<128x256xbf16>
    %cst_58 = arith.constant dense<0.000000e+00> : vector<8x256xf32>
    %165 = tpu.matmul %163, %164, %cst_58 {dimension_numbers = #tpu.dot_dimension_numbers<[1], [0], [0], [1], [0, 0, 1, 1], [], []>} : vector<8x128xbf16>, vector<128x256xbf16>, vector<8x256xf32> -> vector<8x256xf32>
    %c0_59 = arith.constant 0 : index
    %c0_60 = arith.constant 0 : index
    %166 = vector.load %arg12[%c0_59, %c0_60] : memref<1x256xf32, #tpu.memory_space<vmem>>, vector<1x256xf32>
    %167 = vector.broadcast %166 : vector<1x256xf32> to vector<8x256xf32>
    %168 = arith.addf %165, %167 : vector<8x256xf32>
    %cst_61 = arith.constant 0.000000e+00 : f32
    %169 = vector.broadcast %cst_61 : f32 to vector<8x256xf32>
    %170 = arith.maximumf %168, %169 : vector<8x256xf32>
    %171 = arith.truncf %170 : vector<8x256xf32> to vector<8x256xbf16>
    %c0_62 = arith.constant 0 : index
    %c0_63 = arith.constant 0 : index
    %172 = vector.load %arg13[%c0_62, %c0_63] : memref<256x128xbf16, #tpu.memory_space<vmem>>, vector<256x128xbf16>
    %cst_64 = arith.constant dense<0.000000e+00> : vector<8x128xf32>
    %173 = tpu.matmul %171, %172, %cst_64 {dimension_numbers = #tpu.dot_dimension_numbers<[1], [0], [0], [1], [0, 0, 1, 1], [], []>} : vector<8x256xbf16>, vector<256x128xbf16>, vector<8x128xf32> -> vector<8x128xf32>
    %c0_65 = arith.constant 0 : index
    %c0_66 = arith.constant 0 : index
    %174 = vector.load %arg14[%c0_65, %c0_66] : memref<1x128xf32, #tpu.memory_space<vmem>>, vector<1x128xf32>
    %175 = vector.broadcast %174 : vector<1x128xf32> to vector<8x128xf32>
    %176 = arith.addf %173, %175 : vector<8x128xf32>
    %177 = arith.addf %139, %176 : vector<8x128xf32>
    %c0_67 = arith.constant 0 : index
    %c0_68 = arith.constant 0 : index
    %c0_69 = arith.constant 0 : index
    %178 = vector.load %arg15[%c0_67, %c0_68, %c0_69] : memref<1x8x128xf32, #tpu.memory_space<vmem>>, vector<1x8x128xf32>
    %179 = vector.shape_cast %178 : vector<1x8x128xf32> to vector<8x128xf32>
    %180 = vector.shape_cast %177 : vector<8x128xf32> to vector<1x8x128xf32>
    tpu.vector_store %arg15[%c0_67, %c0_68, %c0_69], %180 {strides = array<i32>} : memref<1x8x128xf32, #tpu.memory_space<vmem>>, vector<1x8x128xf32>,
    return
  }
  func.func @transform_0(%arg0: i32) -> (i32, i32, i32) {
    %c0_i32 = arith.constant 0 : i32
    %c0_i32_0 = arith.constant 0 : i32
    %c0_i32_1 = arith.constant 0 : i32
    return %arg0, %c0_i32, %c0_i32_0 : i32, i32, i32
  }
  func.func @transform_1(%arg0: i32) -> (i32, i32, i32) {
    %c0_i32 = arith.constant 0 : i32
    %c0_i32_0 = arith.constant 0 : i32
    %c0_i32_1 = arith.constant 0 : i32
    return %arg0, %c0_i32, %c0_i32_0 : i32, i32, i32
  }
  func.func @transform_2(%arg0: i32) -> (i32, i32) {
    %c0_i32 = arith.constant 0 : i32
    %c0_i32_0 = arith.constant 0 : i32
    %c0_i32_1 = arith.constant 0 : i32
    return %c0_i32, %c0_i32_0 : i32, i32
  }
  func.func @transform_3(%arg0: i32) -> (i32, i32) {
    %c0_i32 = arith.constant 0 : i32
    %c0_i32_0 = arith.constant 0 : i32
    %c0_i32_1 = arith.constant 0 : i32
    return %c0_i32, %c0_i32_0 : i32, i32
  }
  func.func @transform_4(%arg0: i32) -> (i32, i32) {
    %c0_i32 = arith.constant 0 : i32
    %c0_i32_0 = arith.constant 0 : i32
    %c0_i32_1 = arith.constant 0 : i32
    return %c0_i32, %c0_i32_0 : i32, i32
  }
  func.func @transform_5(%arg0: i32) -> (i32, i32) {
    %c0_i32 = arith.constant 0 : i32
    %c0_i32_0 = arith.constant 0 : i32
    %c0_i32_1 = arith.constant 0 : i32
    return %c0_i32, %c0_i32_0 : i32, i32
  }
  func.func @transform_6(%arg0: i32) -> (i32, i32) {
    %c0_i32 = arith.constant 0 : i32
    %c0_i32_0 = arith.constant 0 : i32
    %c0_i32_1 = arith.constant 0 : i32
    return %c0_i32, %c0_i32_0 : i32, i32
  }
  func.func @transform_7(%arg0: i32) -> (i32, i32) {
    %c0_i32 = arith.constant 0 : i32
    %c0_i32_0 = arith.constant 0 : i32
    %c0_i32_1 = arith.constant 0 : i32
    return %c0_i32, %c0_i32_0 : i32, i32
  }
  func.func @transform_8(%arg0: i32) -> (i32, i32) {
    %c0_i32 = arith.constant 0 : i32
    %c0_i32_0 = arith.constant 0 : i32
    %c0_i32_1 = arith.constant 0 : i32
    return %c0_i32, %c0_i32_0 : i32, i32
  }
  func.func @transform_9(%arg0: i32) -> (i32, i32) {
    %c0_i32 = arith.constant 0 : i32
    %c0_i32_0 = arith.constant 0 : i32
    %c0_i32_1 = arith.constant 0 : i32
    return %c0_i32, %c0_i32_0 : i32, i32
  }
  func.func @transform_10(%arg0: i32) -> (i32, i32) {
    %c0_i32 = arith.constant 0 : i32
    %c0_i32_0 = arith.constant 0 : i32
    %c0_i32_1 = arith.constant 0 : i32
    return %c0_i32, %c0_i32_0 : i32, i32
  }
  func.func @transform_11(%arg0: i32) -> (i32, i32) {
    %c0_i32 = arith.constant 0 : i32
    %c0_i32_0 = arith.constant 0 : i32
    %c0_i32_1 = arith.constant 0 : i32
    return %c0_i32, %c0_i32_0 : i32, i32
  }
  func.func @transform_12(%arg0: i32) -> (i32, i32) {
    %c0_i32 = arith.constant 0 : i32
    %c0_i32_0 = arith.constant 0 : i32
    %c0_i32_1 = arith.constant 0 : i32
    return %c0_i32, %c0_i32_0 : i32, i32
  }
  func.func @transform_13(%arg0: i32) -> (i32, i32) {
    %c0_i32 = arith.constant 0 : i32
    %c0_i32_0 = arith.constant 0 : i32
    %c0_i32_1 = arith.constant 0 : i32
    return %c0_i32, %c0_i32_0 : i32, i32
  }
  func.func @transform_14(%arg0: i32) -> (i32, i32, i32) {
    %c0_i32 = arith.constant 0 : i32
    %c0_i32_0 = arith.constant 0 : i32
    %c0_i32_1 = arith.constant 0 : i32
    return %arg0, %c0_i32, %c0_i32_0 : i32, i32, i32
  }
}

</mosaic_0001>

<bundles_post_ra>
// kernel: tpu_custom_call.1
= control target key start
LH: loop header
LB: loop body
LE: loop exit
PB: predicated region body
PF: predicated region fallthrough
CT: control target
= control target key end

     0   :  { %s3378_s0 = inlined_call_operand.hbm [shape: f32[2,8,128], index: 0, kind: input, shape index: {}]   ;;  %s3379_s1 = inlined_call_operand.vmem [shape: f32[2,1,8], index: 1, kind: input, shape index: {}]   ;;  %s3380_s2 = inlined_call_operand.hbm [shape: f32[1,128], index: 2, kind: input, shape index: {}]   ;;  %s3381_s3 = inlined_call_operand.vmem [shape: f32[1,128], index: 3, kind: input, shape index: {}]   ;;  %s3382_s4 = inlined_call_operand.hbm [shape: bf16[128,384], index: 4, kind: input, shape index: {}]   ;;  %s3383_s5 = inlined_call_operand.vmem [shape: f32[1,384], index: 5, kind: input, shape index: {}]   ;;  %s3384_s6 = inlined_call_operand.hbm [shape: bf16[128,128], index: 6, kind: input, shape index: {}]   ;;  %s3385_s7 = inlined_call_operand.vmem [shape: f32[1,128], index: 7, kind: input, shape index: {}]   ;;  %s3386_s8 = inlined_call_operand.vmem [shape: f32[1,128], index: 8, kind: input, shape index: {}]   ;;  %s3387_s9 = inlined_call_operand.vmem [shape: f32[1,128], index: 9, kind: input, shape index: {}]   ;;  %s3388_s10 = inlined_call_operand.hbm [shape: bf16[128,256], index: 10, kind: input, shape index: {}]   ;;  %s3389_s11 = inlined_call_operand.vmem [shape: f32[1,256], index: 11, kind: input, shape index: {}]   ;;  %s3390_s12 = inlined_call_operand.hbm [shape: bf16[256,128], index: 12, kind: input, shape index: {}]   ;;  %s3391_s13 = inlined_call_operand.vmem [shape: f32[1,128], index: 13, kind: input, shape index: {}]   ;;  %s3392_s14 = inlined_call_operand.hbm [shape: f32[2,8,128], index: 14, kind: output, shape index: {}]  }
   0x1   :  { %3399 = sst [smem:[#allocation19_spill]] %s3380_s2 }
   0x2   :  { %3400 = sst [smem:[#allocation20_spill]] %s3384_s6 }
   0x3   :  { %3401 = sst [smem:[#allocation21_spill]] %s3387_s9 }
   0x4   :  { %3402 = sst [smem:[#allocation22_spill]] %s3389_s11 }
   0x5   :  { %3403 = sst [smem:[#allocation23_spill]] %s3391_s13 }
   0x6   :  { %3404 = sst [smem:[#allocation24_spill]] %s3392_s14 }
   0x7   :  { %19 = vsyncpa [#allocation3], 0 }
   0x8   :  { %21 = vsyncpa [#allocation3 + $0x1], 0 }
   0x9   :  { %22 = vsyncpa [#allocation6], 0 }
   0xa   :  { %23 = vsyncpa [#allocation9], 0 }
   0xb   :  { %24 = vsyncpa [#allocation12], 0 }
   0xc   :  { %25 = vsyncpa [#allocation4], 0 }
   0xd   :  { %27 = vsyncpa [#allocation4 + $0x1], 0  ;;  %s2894_s29 = smov 0   ;;  %s2896_s30 = smov 0  }
   0xe   :  { %s2898_s15 = smov 0   ;;  %s2900_s16 = smov 0  }
   0xf LB: > { %s2800_s17 = smov [#allocation5]   ;;  %s2915_s19 = sadd.s32 4294967295, %s2798_s16   ;;  %s2798_s16 = sphi %s2900_s16, %s3434_s16   ;;  %s2794_s15 = sphi %s2898_s15, %s3433_s15   ;;  %s2790_s30 = sphi %s2896_s30, %s3432_s30   ;;  %s2786_s29 = sphi %s2894_s29, %s3431_s29  }
  0x10   : > { %s381_s18 = sshll.u32 %s2800_s17, 4  ;;  %p2075_p0 = scmp.ge.s32.totalorder %s2798_s16, 1  ;;  %s2920_s18 = int_to_ptr.vmem [resolvable:$true] %s381_s18 }
  0x11   : > { %p3396_p1 = scmp.eq.s32.totalorder %s2915_s19, 0  ;;  %p368_p2 = scmp.lt.s32.totalorder %s2798_s16, 3 }
  0x12   : > { %s2801_s21 = smov [#allocation8]   ;;  %s2802_s24 = smov [#allocation7]  }
  0x13   : > { %p2922_p3 = pnand %p2075_p0, %p368_p2  ;;  %s410_s22 = sshll.u32 %s2801_s21, 4  ;;  %s2929_s22 = int_to_ptr.vmem [resolvable:$true] %s410_s22 }
  0x14   : > { %s394_s25 = sshll.u32 %s2802_s24, 4  ;;  %s3407_s2 = sld [smem:[#allocation19_spill]]  ;;  %s2937_s25 = int_to_ptr.vmem [resolvable:$true] %s394_s25 }
  0x15   : > { %s3405_s20 = scalar_select %p2922_p3, 1, 0 }
  0x16   : > { %p2361_p5 = pneg %p2922_p3 }
  0x18   : > { %p2933_p6 = pnand %p2361_p5, %p3396_p1 }
  0x1a   : > { %s2550_s28 = scalar_lea.hbm %s3407_s2, 16  ;;  %p2947_p8 = pneg %p2933_p6 }
  0x1b   : > { %p2551_p7 = scmp.ne.s32.totalorder %s3407_s2, %s2550_s28  ;;  %p2557_p11 = scmp.lt.u32.totalorder %s2550_s28, %s3407_s2 }
  0x1d   : > { %p2553_p9 = pnand %p2947_p8, %p2551_p7 }
  0x1f   : > { %p2554_p10 = pneg %p2553_p9 }
  0x21   : > { %p2559_p12 = pnand %p2557_p11, %p2554_p10 }
  0x23   : > { %2562 = shalt.err (!%p2559_p12)
}
  0x24   : > { %s2563_s14 = scalar_lea.vmem %s2920_s18, 16  ;;  %s2570_s26 = scalar_lea.vmem %s2920_s18, 32 }
  0x25   : > { %p2564_p13 = scmp.ne.s32.totalorder %s2920_s18, %s2563_s14  ;;  %p2571_p5 = scmp.lt.s32.totalorder %s2920_s18, %s2920_s18 }
  0x26   : > { %p2572_p7 = scmp.lt.s32.totalorder %s2570_s26, %s2563_s14 }
  0x27   : > { %p2566_p0 = pnand %p2564_p13, %p2947_p8 }
  0x28   : > { %p2573_p9 = por %p2572_p7, %p2571_p5 }
  0x29   : > { %p2567_p2 = pneg %p2566_p0 }
  0x2b   : > { %p2574_p4 = pnand %p2573_p9, %p2567_p2 }
  0x2d   : > { %2577 = shalt.err (!%p2574_p4)
}
  0x2e   : > { %2364 = dma.hbm_to_vmem [thread:$0]  (!%p2933_p6), %s3407_s2, 16, %s2920_s18, [#allocation6]  }
  0x2f   : > { %s3409_s6 = sld [smem:[#allocation20_spill]] }
  0x35   : > { %s2578_s24 = scalar_lea.hbm %s3409_s6, 1024 }
  0x36   : > { %p2579_p10 = scmp.ne.s32.totalorder %s3409_s6, %s2578_s24  ;;  %p2585_p4 = scmp.lt.u32.totalorder %s2578_s24, %s3409_s6 }
  0x38   : > { %p2581_p11 = pnand %p2579_p10, %p2947_p8 }
  0x3a   : > { %p2582_p12 = pneg %p2581_p11 }
  0x3c   : > { %p2587_p13 = pnand %p2585_p4, %p2582_p12 }
  0x3e   : > { %2590 = shalt.err (!%p2587_p13)
}
  0x3f   : > { %s2591_s18 = scalar_lea.vmem %s2929_s22, 1024  ;;  %p2599_p7 = scmp.lt.s32.totalorder %s2929_s22, %s2929_s22 }
  0x40   : > { %p2592_p0 = scmp.ne.s32.totalorder %s2929_s22, %s2591_s18  ;;  %p2600_p9 = scmp.lt.s32.totalorder %s2591_s18, %s2591_s18 }
  0x42   : > { %p2594_p2 = pnand %p2592_p0, %p2947_p8  ;;  %p2601_p10 = por %p2600_p9, %p2599_p7 }
  0x44   : > { %p2595_p5 = pneg %p2594_p2 }
  0x46   : > { %p2602_p11 = pnand %p2601_p10, %p2595_p5 }
  0x48   : > { %2605 = shalt.err (!%p2602_p11)
}
  0x49   : > { %s3394_s9 = smov 64   ;;  %s3395_s11 = smov 4  }
  0x4a   : > { %2370 = dma.hbm_to_vmem [thread:$0]  (!%p2933_p6), %s3409_s6, 1024, %s2929_s22, [#allocation9], %s3394_s9, %s3394_s9, %s3395_s11  }
  0x4b   : > { %s2606_s24 = scalar_lea.hbm %s3382_s4, 3072 }
  0x4c   : > { %p2607_p12 = scmp.ne.s32.totalorder %s3382_s4, %s2606_s24  ;;  %p2613_p0 = scmp.lt.u32.totalorder %s2606_s24, %s3382_s4 }
  0x4e   : > { %p2609_p4 = pnand %p2607_p12, %p2947_p8 }
  0x50   : > { %p2610_p13 = pneg %p2609_p4 }
  0x52   : > { %p2615_p2 = pnand %p2613_p0, %p2610_p13 }
  0x54   : > { %2618 = shalt.err (!%p2615_p2)
}
  0x55   : > { %s2619_s22 = scalar_lea.vmem %s2937_s25, 3072  ;;  %p2627_p10 = scmp.lt.s32.totalorder %s2937_s25, %s2937_s25 }
  0x56   : > { %p2620_p5 = scmp.ne.s32.totalorder %s2937_s25, %s2619_s22  ;;  %p2628_p11 = scmp.lt.s32.totalorder %s2619_s22, %s2619_s22 }
  0x58   : > { %p2622_p7 = pnand %p2620_p5, %p2947_p8  ;;  %p2629_p12 = por %p2628_p11, %p2627_p10 }
  0x5a   : > { %p2623_p9 = pneg %p2622_p7 }
  0x5c   : > { %p2630_p4 = pnand %p2629_p12, %p2623_p9 }
  0x5e   : > { %2633 = shalt.err (!%p2630_p4)
}
  0x5f   : > { %s2805_s13 = smov 192   ;;  %s2806_s2 = smov 12  }
  0x60   : > { %2367 = dma.hbm_to_vmem [thread:$0]  (!%p2933_p6), %s3382_s4, 3072, %s2937_s25, [#allocation6], %s2805_s13, %s2805_s13, %s2806_s2  }
  0x61   : > { %s2807_s17 = smov [#allocation10]   ;;  %s2634_s18 = scalar_lea.hbm %s3388_s10, 2048 }
  0x62   : > { %s432_s24 = sshll.u32 %s2807_s17, 4  ;;  %p2635_p13 = scmp.ne.s32.totalorder %s3388_s10, %s2634_s18  ;;  %s433_s24 = int_to_ptr.vmem [resolvable:$true] %s432_s24 }
  0x63   : > { %p2641_p5 = scmp.lt.u32.totalorder %s2634_s18, %s3388_s10 }
  0x64   : > { %p2637_p0 = pnand %p2635_p13, %p2947_p8 }
  0x66   : > { %p2638_p2 = pneg %p2637_p0 }
  0x68   : > { %p2643_p7 = pnand %p2641_p5, %p2638_p2 }
  0x6a   : > { %2646 = shalt.err (!%p2643_p7)
}
  0x6b   : > { %s2647_s25 = scalar_lea.vmem %s433_s24, 2048  ;;  %p2655_p12 = scmp.lt.s32.totalorder %s433_s24, %s433_s24 }
  0x6c   : > { %p2648_p9 = scmp.ne.s32.totalorder %s433_s24, %s2647_s25  ;;  %p2656_p4 = scmp.lt.s32.totalorder %s2647_s25, %s2647_s25 }
  0x6e   : > { %p2650_p10 = pnand %p2648_p9, %p2947_p8  ;;  %p2657_p1 = por %p2656_p4, %p2655_p12 }
  0x70   : > { %p2651_p11 = pneg %p2650_p10 }
  0x72   : > { %p2658_p3 = pnand %p2657_p1, %p2651_p11 }
  0x74   : > { %2661 = shalt.err (!%p2658_p3)
}
  0x75   : > { %s2808_s9 = smov 128   ;;  %s2809_s13 = smov 8  }
  0x76   : > { %2373 = dma.hbm_to_vmem [thread:$0]  (!%p2933_p6), %s3388_s10, 2048, %s433_s24, [#allocation9], %s2808_s9, %s2808_s9, %s2809_s13  }
  0x77   : > { %s2810_s2 = smov [#allocation11]   ;;  %s2662_s14 = scalar_lea.hbm %s3390_s12, 2048 }
  0x78   : > { %s448_s27 = sshll.u32 %s2810_s2, 4  ;;  %p2663_p1 = scmp.ne.s32.totalorder %s3390_s12, %s2662_s14  ;;  %s449_s27 = int_to_ptr.vmem [resolvable:$true] %s448_s27 }
  0x79   : > { %p2669_p0 = scmp.lt.u32.totalorder %s2662_s14, %s3390_s12 }
  0x7a   : > { %p2665_p3 = pnand %p2663_p1, %p2947_p8 }
  0x7c   : > { %p2666_p13 = pneg %p2665_p3 }
  0x7e   : > { %p2671_p2 = pnand %p2669_p0, %p2666_p13 }
  0x80   : > { %2674 = shalt.err (!%p2671_p2)
}
  0x81   : > { %s2675_s24 = scalar_lea.vmem %s449_s27, 2048  ;;  %p2683_p10 = scmp.lt.s32.totalorder %s449_s27, %s449_s27 }
  0x82   : > { %p2676_p5 = scmp.ne.s32.totalorder %s449_s27, %s2675_s24  ;;  %p2684_p11 = scmp.lt.s32.totalorder %s2675_s24, %s2675_s24 }
  0x84   : > { %p2678_p7 = pnand %p2676_p5, %p2947_p8  ;;  %p2685_p12 = por %p2684_p11, %p2683_p10 }
  0x86   : > { %p2679_p9 = pneg %p2678_p7 }
  0x88   : > { %p2686_p4 = pnand %p2685_p12, %p2679_p9 }
  0x8a   : > { %2689 = shalt.err (!%p2686_p4)
}
  0x8b   : > { %s3410_s9 = smov 4   ;;  %s3411_s13 = smov 64  }
  0x8c   : > { %2376 = dma.hbm_to_vmem [thread:$0]  (!%p2933_p6), %s3390_s12, 2048, %s449_s27, [#allocation12], %s3411_s13, %s3411_s13, %s3410_s9  }
  0x8d   : > { %s2074_s23 = sadd.s32 4294967294, %s2798_s16   ;;  %s3059_s21 = sadd.s32 1, %s2798_s16  }
  0x8e   : > { %s40_s2 = sadd.s32 1, %s2794_s15  ;;  %s37_s28 = ssub.s32 %s2798_s16, %s3059_s21 }
  0x8f   : > { %p47_p8 = scmp.ne.s32.totalorder %s2794_s15, %s2790_s30  ;;  %p38_p1 = scmp.eq.s32.totalorder %s37_s28, 0 }
  0x90   : > { %p48_p3 = scmp.eq.s32.totalorder %s2798_s16, 0  ;;  %p53_p13 = scmp.ne.s32.totalorder %s2790_s30, %s2786_s29 }
  0x91   : > { %p355_p0 = scmp.eq.s32.totalorder %s2915_s19, 1  ;;  %p3412_p5 = scmp.eq.s32.totalorder %s2915_s19, 0 }
  0x92   : > { %s3071_s17 = scalar_select %p38_p1, %s2794_s15, %s40_s2  }
  0x93   : > { %p49_p2 = por %p48_p3, %p47_p8  ;;  %p3075_p7 = por %p3412_p5, %p53_p13 }
  0x94   : > { %p3079_p6 = por %p355_p0, %p47_p8  ;;  %p361_p9 = scmp.eq.s32.totalorder %s2074_s23, 1 }
  0x95   : > { %p2390_p10 = scmp.lt.s32.totalorder %s2798_s16, 2  ;;  %s465_s26 = sand.u32 1, %s2794_s15  }
  0x96   : > { %s3414_s27 = scalar_select %p3079_p6, 1, 0 }
  0x97   : > { %p3085_p11 = por %p361_p9, %p53_p13  ;;  %s2082_s22 = sshll.u32 %s465_s26, 3 }
  0x98   : > { %s2083_s25 = sshll.u32 %s2798_s16, 7  ;;  %s469_s6 = scalar_lea.vmem [#allocation2], %s2082_s22 }
  0x99   : > { %s3415_s18 = scalar_select %p3085_p11, 1, 0 }
  0x9a   : > { %s3093_s13 = scalar_lea.hbm %s3378_s0, %s2083_s25  ;;  %s476_s11 = sshll.u32 %s469_s6, 4  ;;  %s3099_s11 = int_to_ptr.vmem [resolvable:$true] %s476_s11 }
  0x9b   : > { %p3095_p12 = pnand %p2390_p10, %p49_p2  ;;  %s466_s2 = scalar_lea.sflag [#allocation3], %s465_s26 }
  0x9c   : > { %s2690_s28 = scalar_lea.hbm %s3093_s13, 128  ;;  %s2695_s24 = scalar_lea.hbm %s3378_s0, 256 }
  0x9d   : > { %p2691_p4 = scmp.ne.s32.totalorder %s3093_s13, %s2690_s28  ;;  %p2692_p8 = pneg %p3095_p12 }
  0x9e   : > { %p2696_p13 = scmp.lt.u32.totalorder %s3093_s13, %s3378_s0  ;;  %p2697_p0 = scmp.lt.u32.totalorder %s2695_s24, %s2690_s28 }
  0x9f   : > { %p2693_p1 = pnand %p2692_p8, %p2691_p4  ;;  %p2699_p5 = scmp.lt.u32.totalorder %s2690_s28, %s3093_s13 }
  0xa0   : > { %p2698_p2 = por %p2697_p0, %p2696_p13 }
  0xa1   : > { %p2694_p3 = pneg %p2693_p1 }
  0xa2   : > { %p2700_p9 = por %p2699_p5, %p2698_p2 }
  0xa4   : > { %p2701_p10 = pnand %p2700_p9, %p2694_p3 }
  0xa6   : > { %2704 = shalt.err (!%p2701_p10)
}
  0xa7   : > { %s2705_s26 = scalar_lea.vmem %s3099_s11, 128  ;;  %s2811_s25 = smov [#allocation2]  }
  0xa8   : > { %p2706_p4 = scmp.ne.s32.totalorder %s3099_s11, %s2705_s26  ;;  %s2710_s22 = sshll.u32 %s2811_s25, 4  ;;  %s2711_s22 = int_to_ptr.vmem [resolvable:$false] %s2710_s22 }
  0xa9   : > { %s2712_s9 = scalar_lea.vmem %s2711_s22, 256  ;;  %p2713_p6 = scmp.lt.s32.totalorder %s3099_s11, %s2711_s22 }
  0xaa   : > { %p2708_p1 = pnand %p2706_p4, %p2692_p8  ;;  %p2714_p13 = scmp.lt.s32.totalorder %s2712_s9, %s2705_s26 }
  0xac   : > { %p2709_p11 = pneg %p2708_p1  ;;  %p2715_p0 = por %p2714_p13, %p2713_p6 }
  0xae   : > { %p2716_p2 = pnand %p2715_p0, %p2709_p11 }
  0xb0   : > { %2719 = shalt.err (!%p2716_p2)
}
  0xb1   : > { %2380 = dma.hbm_to_vmem [thread:$0]  (!%p3095_p12), %s3093_s13, 128, %s3099_s11, %s466_s2  }
  0xb2   : > { %p3417_p3 = scmp.ne.s32.totalorder %s3405_s20, 0 }
  0xb3   : > { %s3129_s28 = sand.u32 (!%p3417_p3), 1, %s2790_s30  }
  0xb4   : > { %491 = sbr.rel (%p3417_p3) target bundleno = 3895 (0xf37), region = 76  ;;  %s2085_s24 = sshll.u32 (!%p3417_p3), %s3129_s28, 3 }
  0xb5   : > { %s494_s6 = scalar_lea.sflag (!%p3417_p3), [#allocation3], %s3129_s28  ;;  %s497_s26 = scalar_lea.vmem (!%p3417_p3), [#allocation2], %s2085_s24 }
  0xbb   : > { %2765 = dma.done.wait (%p3075_p7), %s494_s6, 128  }
  0xbc   : > { %2767 = vsyncadd (%p3075_p7), %s494_s6, 4294967168  ;;  %p3418_p6 = scmp.eq.s32.totalorder %s2915_s19, 0 }
  0xbe   : > { %2769 = dma.done.wait (%p3418_p6), [#allocation6], 3088   ;;  %p3419_p11 = pmov %p3418_p6 }
  0xbf   : > { %p3420_p12 = pmov %p3418_p6 }
  0xc0   : > { %2771 = vsyncadd (%p3419_p11), [#allocation6], 4294964208 }
  0xc1   : > { %2773 = dma.done.wait (%p3420_p12), [#allocation9], 3072   ;;  %p3421_p8 = pmov %p3418_p6 }
  0xc2   : > { %p3422_p5 = pmov %p3418_p6 }
  0xc3   : > { %2775 = vsyncadd (%p3421_p8), [#allocation9], 4294964224 }
  0xc4   : > { %2777 = dma.done.wait (%p3422_p5), [#allocation12], 2048   ;;  %p3423_p9 = pmov %p3422_p5 }
  0xc5   : > { %v3151_v0 = vld [vmem:[%s497_s26] sm:$0xff]  ;;  %v2812_v8 = vmov 0.0   ;;  %v2813_v22 = vmov 0   ;;  %vm2814_vm0 = vmmov 0   ;;  %v2092_v39 = vld [vmem:[#allocation5] ss:$0 sm:$0xff]  ;;  %v641_v46 = vlaneseq }
  0xc6   : > { %2779 = vsyncadd (%p3423_p9), [#allocation12], 4294965248  ;;  %573 = vadd.xlane.f32.xlu0 %v3151_v0  ;;  %v2446_v5 = vld [vmem:[#allocation7 + $0x4] ss:$12 sps:$4 sm:$0xff]   ;;  %v2448_v6 = vld [vmem:[#allocation7] ss:$12 sps:$4 sm:$0xff]   ;;  %2237 = vmatprep.subr.bf16.mxu1 %v2812_v8 }
  0xc7   : > { %v2449_v7 = vld [vmem:[#allocation7 + $0x8] ss:$12 sps:$4 sm:$0xff]   ;;  %784 = vmatprep.subr.bf16.mxu0 %v2446_v5  ;;  %v2452_v10 = vld [vmem:[#allocation7 + $0x18] ss:$12 sps:$4 sm:$0xff]   ;;  %v2453_v11 = vld [vmem:[#allocation7 + $0x20] ss:$12 sps:$4 sm:$0xff]   ;;  %816 = vmatprep.mubr.bf16.mxu0 %v2813_v22 }
  0xc8   : > { %785 = vmatpush1.bf16.msra.mxu0 %v2448_v6  ;;  %2238 = vmatpush3.bf16.msra.mxu1 %v2449_v7  ;;  %v2450_v9 = vld [vmem:[#allocation7 + $0x1c] ss:$12 sps:$4 sm:$0xff]   ;;  %v2454_v12 = vld [vmem:[#allocation7 + $0x34] ss:$12 sps:$4 sm:$0xff]   ;;  %v2457_v14 = vld [vmem:[#allocation7 + $0x38] ss:$12 sps:$4 sm:$0xff]  }
  0xc9   : > { %2239 = vmatprep.subr.bf16.mxu1 %v2812_v8  ;;  %786 = vmatprep.subr.bf16.mxu0 %v2450_v9  ;;  %v2456_v13 = vld [vmem:[#allocation7 + $0x30] ss:$12 sps:$4 sm:$0xff]   ;;  %v2458_v15 = vld [vmem:[#allocation7 + $0x4c] ss:$12 sps:$4 sm:$0xff]   ;;  %v2460_v16 = vld [vmem:[#allocation7 + $0x48] ss:$12 sps:$4 sm:$0xff]  }
  0xca   : > { %v2461_v17 = vld [vmem:[#allocation7 + $0x50] ss:$12 sps:$4 sm:$0xff]   ;;  %v2464_v19 = vld [vmem:[#allocation7 + $0x60] ss:$12 sps:$4 sm:$0xff]   ;;  %v2465_v20 = vld [vmem:[#allocation7 + $0x68] ss:$12 sps:$4 sm:$0xff]   ;;  %2253 = vmatprep.mubr.msk.bf16.mxu1 %vm2814_vm0, %v2812_v8 }
  0xcb   : > { %v2462_v18 = vld [vmem:[#allocation7 + $0x64] ss:$12 sps:$4 sm:$0xff]   ;;  %v2466_v21 = vld [vmem:[#allocation7 + $0x7c] ss:$12 sps:$4 sm:$0xff]   ;;  %v2469_v24 = vld [vmem:[#allocation7 + $0x80] ss:$12 sps:$4 sm:$0xff]  }
  0xcc   : > { %787 = vmatpush1.bf16.msra.mxu0 %v2452_v10  ;;  %2240 = vmatpush3.bf16.msra.mxu1 %v2453_v11  ;;  %v2468_v23 = vld [vmem:[#allocation7 + $0x78] ss:$12 sps:$4 sm:$0xff]   ;;  %v2470_v25 = vld [vmem:[#allocation7 + $0x94] ss:$12 sps:$4 sm:$0xff]   ;;  %v2472_v26 = vld [vmem:[#allocation7 + $0x90] ss:$12 sps:$4 sm:$0xff]  }
  0xcd   : > { %2241 = vmatprep.subr.bf16.mxu1 %v2812_v8  ;;  %788 = vmatprep.subr.bf16.mxu0 %v2454_v12  ;;  %v2473_v27 = vld [vmem:[#allocation7 + $0x98] ss:$12 sps:$4 sm:$0xff]   ;;  %v2476_v29 = vld [vmem:[#allocation7 + $0xa8] ss:$12 sps:$4 sm:$0xff]   ;;  %v2477_v30 = vld [vmem:[#allocation7 + $0xb0] ss:$12 sps:$4 sm:$0xff]  }
  0xce   : > { %v2474_v28 = vld [vmem:[#allocation7 + $0xac] ss:$12 sps:$4 sm:$0xff]   ;;  %v3180_v47 = vshrl.u32 %v641_v46, 7  ;;  %vm956_vm3 = vcmask 1043456   ;;  %vm893_vm4 = vcmask 261120   ;;  %s2815_s23 = smov 96  }
  0xcf   : > { %v2093_v42 = vld [vmem:[%s3381_s3] ss:$0 sm:$0xff]  ;;  %p565_p7 = scmp.lt.s32.totalorder %s2915_s19, 1  ;;  %vm940_vm6 = vcmask 64512   ;;  %s2816_s6 = smov 64  }
  0xd0   : > { %789 = vmatpush1.bf16.msra.mxu0 %v2456_v13  ;;  %2242 = vmatpush3.bf16.msra.mxu1 %v2457_v14  ;;  %v3183_v48 = vsub.s32 0, %v3180_v47  ;;  %v651_v49 = vsub.s32 2, %v3180_v47  ;;  %v639_v50 = vld [vmem:[%s3383_s5] sm:$0x7]  ;;  %v647_v51 = vsub.s32 1, %v3180_v47  ;;  %s2817_s26 = smov 32  }
  0xd1   : > { %2243 = vmatprep.subr.bf16.mxu1 %v2812_v8  ;;  %790 = vmatprep.subr.bf16.mxu0 %v2458_v15  ;;  %s566_s2 = scalar_select %p565_p7, %s2915_s19, 1 }
  0xd2   : > { %v644_v52 = vrot.slane %v639_v50, %v3183_v48  ;;  %v652_v53 = vrot.slane %v639_v50, %v651_v49  ;;  %v648_v54 = vrot.slane %v639_v50, %v647_v51  ;;  %s3424_s25 = sld [smem:[#allocation21_spill]]  ;;  %s3426_s14 = sld [smem:[#allocation23_spill]] }
  0xd3   : > { %s567_s9 = scalar_lea.vmem %s3379_s1, %s566_s2  ;;  %s2175_s13 = sshll.u32 %s2915_s19, 7 }
  0xd4   : > { %791 = vmatpush1.bf16.msra.mxu0 %v2460_v16  ;;  %2244 = vmatpush3.bf16.msra.mxu1 %v2461_v17  ;;  %v570_v13 = vld [vmem:[%s567_s9] sm:$0x1]  ;;  %s564_s11 = scalar_lea.vmem [#allocation13], %s2085_s24  ;;  %s3427_s22 = sld [smem:[#allocation24_spill]] }
  0xd5   : > { %792 = vmatprep.subr.bf16.mxu0 %v2462_v18  ;;  %2245 = vmatprep.subr.bf16.mxu1 %v2812_v8  ;;  %vm869_vm5 = vcmp.eq.f32.partialorder %v570_v13, 0.0  ;;  %p3428_p4 = scmp.ne.s32.totalorder %s3414_s27, 0  ;;  %s2818_s19 = smov [#allocation13]  }
  0xd6   : > { %v870_v14 = vsel %vm869_vm5, -1e+10, %v2812_v8  ;;  %s2724_s24 = sshll.u32 %s2818_s19, 4  ;;  %s2725_s24 = int_to_ptr.vmem [resolvable:$false] %s2724_s24 }
  0xd7   : > { %v3225_v15 = vrot.slane %v870_v14, %v3183_v48  ;;  %s2726_s20 = scalar_lea.vmem %s2725_s24, 256 }
  0xd8   : > { %793 = vmatpush1.bf16.msra.mxu0 %v2464_v19  ;;  %2246 = vmatpush3.bf16.msra.mxu1 %v2465_v20  ;;  %v2157_v47 = vld [vmem:[%s3426_s14] ss:$0 sm:$0xff] }
  0xd9   : > { %794 = vmatprep.subr.bf16.mxu0 %v2466_v21  ;;  %2247 = vmatprep.subr.bf16.mxu1 %v2812_v8 }
  0xda   : > { %s3334_s9 = scalar_lea.hbm %s3427_s22, %s2175_s13 }
  0xdc   : > { %795 = vmatpush1.bf16.msra.mxu0 %v2468_v23  ;;  %2248 = vmatpush3.bf16.msra.mxu1 %v2469_v24 }
  0xdd   : > { %796 = vmatprep.subr.bf16.mxu0 %v2470_v25  ;;  %2249 = vmatprep.subr.bf16.mxu1 %v2812_v8 }
  0xe0   : > { %797 = vmatpush1.bf16.msra.mxu0 %v2472_v26  ;;  %2250 = vmatpush3.bf16.msra.mxu1 %v2473_v27 }
  0xe1   : > { %798 = vmatprep.subr.bf16.mxu0 %v2474_v28  ;;  %2251 = vmatprep.subr.bf16.mxu1 %v2812_v8 }
  0xe4   : > { %799 = vmatpush1.bf16.msra.mxu0 %v2476_v29  ;;  %2252 = vmatpush3.bf16.msra.mxu1 %v2477_v30 }
  0xe5   : > { %2263 = vmatprep.subr.bf16.mxu1 %v2812_v8  ;;  %2257 = vmatprep.subr.bf16.mxu0 %v2812_v8 }
 0x153   : > { %v574_v1 = vpop.xlane.xlu0 %573 }
 0x154   : > { %v576_v2 = vmul.f32 0.0078125, %v574_v1 }
 0x156   : > { %v3155_v3 = vsub.f32 %v3151_v0, %v576_v2 }
 0x158   : > { %v578_v4 = vmul.f32 %v3155_v3, %v3155_v3  ;;  %v597_v40 = vmul.f32 %v2092_v39, %v3155_v3 }
 0x15a   : > { %579 = vadd.xlane.f32.xlu0 %v578_v4 }
 0x1e7   : > { %v580_v31 = vpop.xlane.xlu0 %579 }
 0x1e8   : > { %v581_v32 = vmul.f32 0.007874016, %v580_v31 }
 0x1ea   : > { %2526 = vrsqrt.f32 %v581_v32  ;;  %vm584_vm1 = vcmp.eq.f32.partialorder %v581_v32, inf  ;;  %v587_v35 = vand.u32 2147483648, %v581_v32  ;;  %vm586_vm2 = vcmp.eq.f32.partialorder %v581_v32, 0.0 }
 0x1f4   : > { %v2527_v33 = vpop.eup %2526 }
 0x1f5   : > { %v583_v34 = vmul.f32 %v2527_v33, %v581_v32 }
 0x1f7   : > { %v585_v36 = vsel %vm584_vm1, %v581_v32, %v583_v34 }
 0x1f8   : > { %v588_v37 = vsel %vm586_vm2, %v587_v35, %v585_v36 }
 0x1f9   : > { %v589_v38 = vadd.f32 1e-06, %v588_v37 }
 0x1fb   : > { %2528 = vrcp.f32 %v589_v38 }
 0x205   : > { %v2529_v41 = vpop.eup %2528 }
 0x206   : > { %v598_v43 = vmul.f32 %v2529_v41, %v597_v40 }
 0x208   : > { %v605_v44 = vadd.f32 %v2093_v42, %v598_v43  ;;  %v2480_v43 = vld [vmem:[#allocation8 + $0x10] sm:$0xff]  }
 0x20a   : > { %v606_v45 = vpack.c.bf16 %v605_v44, %v605_v44  ;;  %v2481_v44 = vld [vmem:[#allocation8 + $0x18] sm:$0xff]  }
 0x20c   : > { %817 = vmatmul.mubr.bf16.vlgmr.msra.gmra.mrb[0].mxu0 %v606_v45  ;;  %2254 = vmatmul.mubr.bf16.vlgmr.msra.gmra.mrb[0].mxu1 %v606_v45 }
 0x20d   : > { %2259 = vmatprep.mubr.msk.bf16.mxu0 %vm2814_vm0, %v2812_v8  ;;  %2265 = vmatprep.mubr.msk.bf16.mxu1 %vm2814_vm0, %v2812_v8 }
 0x2df   : > { %v818_v55 = vpop.f32.mrb[0].mxu0  ;;  %v859_v56 = vpop.f32.mrb[0].mxu1 }
 0x2e0   : > { %v819_v57 = vadd.f32 %v818_v55, %v644_v52  ;;  %v860_v58 = vadd.f32 %v859_v56, %v652_v53  ;;  %v820_v59 = vpop.f32.mrb[1].mxu0  ;;  %v2255_v60 = vpop.f32.mrb[1].mxu1  ;;  %v2478_v53 = vld [vmem:[#allocation8] sm:$0xff]   ;;  %v2479_v55 = vld [vmem:[#allocation8 + $0x8] sm:$0xff]  }
 0x2e1   : > { %v821_v61 = vadd.f32 %v820_v59, %v648_v54  ;;  %v822_v62 = vpop.f32.mrb[2].mxu0  ;;  %v862_v63 = vpop.f32.mrb[2].mxu1 }
 0x2e2   : > { %v3193_v1 = vpack.c.bf16 %v860_v58, %v860_v58  ;;  %v823_v2 = vpop.f32.mrb[3].mxu0  ;;  %v2256_v3 = vpop.f32.mrb[3].mxu1  ;;  %v865_v4 = vmul.f32 0.17677669, %v819_v57 }
 0x2e3   : > { %v3195_v5 = vpack.c.bf16 %v821_v61, %v821_v61 }
 0x2e4   : > { %v958_v6 = vsel %vm956_vm3, %v3193_v1, 0  ;;  %v3204_v9 = vpack.c.bf16 %v865_v4, %v865_v4 }
 0x2e5   : > { %2264 = vmatpush3.bf16.msra.mxu1 %v958_v6  ;;  %1005 = vrot.lane.b32.xlu1 %v3195_v5, %s2815_s23  ;;  %v898_v7 = vsel %vm893_vm4, %v3195_v5, 0 }
 0x2e6   : > { %2258 = vmatpush3.bf16.xpose.msra.mxu0 %v898_v7  ;;  %2275 = vmatprep.subr.bf16.mxu1 %v2812_v8 }
 0x2e7   : > { %2269 = vmatprep.subr.bf16.mxu0 %v2812_v8 }
 0x2e9   : > { %1002 = vrot.lane.b32.xlu1 %v3204_v9, %s2815_s23 }
 0x2ed   : > { %2260 = vmatmul.mubr.msk.bf16.vlgmr.msra.gmra.mrb[4].mxu0 %vm893_vm4, %v3204_v9 }
 0x2ee   : > { %2271 = vmatprep.mubr.msk.bf16.mxu0 %vm2814_vm0, %v2812_v8 }
 0x357   : > { %v1006_v10 = vpop.permute.xlu1 %1005 }
 0x358   : > { %v1011_v11 = vsel %vm893_vm4, %v1006_v10, 0 }
 0x359   : > { %2270 = vmatpush3.bf16.xpose.msra.mxu0 %v1011_v11 }
 0x35a   : > { %2281 = vmatprep.subr.bf16.mxu0 %v2812_v8 }
 0x35b   : > { %v1003_v12 = vpop.permute.xlu1 %1002 }
 0x360   : > { %2272 = vmatmul.mubr.msk.bf16.vlgmr.msra.gmra.mrb[8].mxu0 %vm893_vm4, %v1003_v12 }
 0x361   : > { %2285 = vmatprep.mubr.msk.bf16.mxu0 %vm2814_vm0, %v2812_v8  ;;  %2282 = vmatpush3.bf16.msra.mxu0 %v2480_v43 }
 0x362   : > { %2283 = vmatprep.subr.bf16.mxu0 %v2812_v8 }
 0x365   : > { %2284 = vmatpush3.bf16.msra.mxu0 %v2481_v44 }
 0x366   : > { %2297 = vmatprep.subr.bf16.mxu0 %v2812_v8 }
 0x3c0   : > { %v934_v16 = vpop.f32.mrb[4].mxu0 }
 0x3c1   : > { %v935_v17 = vadd.f32 %v934_v16, %v3225_v15  ;;  %v2261_v18 = vpop.f32.mrb[5].mxu0 }
 0x3c2   : > { %v937_v19 = vpop.f32.mrb[6].mxu0 }
 0x3c3   : > { %v2262_v20 = vpop.f32.mrb[7].mxu0  ;;  %v941_v21 = vsel %vm940_vm6, %v935_v17, -inf }
 0x3c4   : > { %942 = vmax.xlane.f32.xlu0 %v941_v21 }
 0x433   : > { %v1047_v23 = vpop.f32.mrb[8].mxu0 }
 0x434   : > { %v1048_v24 = vadd.f32 %v1047_v23, %v3225_v15  ;;  %v2273_v25 = vpop.f32.mrb[9].mxu0 }
 0x435   : > { %v1050_v26 = vpop.f32.mrb[10].mxu0 }
 0x436   : > { %v2274_v27 = vpop.f32.mrb[11].mxu0  ;;  %v1053_v28 = vsel %vm940_vm6, %v1048_v24, -inf }
 0x437   : > { %1054 = vmax.xlane.f32.xlu1 %v1053_v28 }
 0x448   : > { %1225 = vrot.lane.b32.xlu1 %v3204_v9, %s2816_s6 }
 0x451   : > { %v943_v29 = vpop.xlane.xlu0 %942 }
 0x452   : > { %v944_v30 = vsub.f32 %v935_v17, %v943_v29 }
 0x454   : > { %v945_v31 = vmul.f32 1.442695, %v944_v30 }
 0x456   : > { %2530 = vpow2.f32 %v945_v31 }
 0x460   : > { %v2531_v32 = vpop.eup %2530 }
 0x461   : > { %v947_v33 = vsel %vm940_vm6, %v2531_v32, 0.0 }
 0x462   : > { %948 = vadd.xlane.f32.xlu0 %v947_v33 }
 0x4c4   : > { %v1055_v34 = vpop.xlane.xlu1 %1054 }
 0x4c5   : > { %v1056_v35 = vsub.f32 %v1048_v24, %v1055_v34  ;;  %v2482_v34 = vld [vmem:[#allocation8 + $0x20] sm:$0xff]  }
 0x4c7   : > { %v1057_v36 = vmul.f32 1.442695, %v1056_v35 }
 0x4c8   : > { %v1226_v7 = vpop.permute.xlu1 %1225 }
 0x4c9   : > { %2532 = vpow2.f32 %v1057_v36 }
 0x4d3   : > { %v2533_v37 = vpop.eup %2532 }
 0x4d4   : > { %v1059_v38 = vsel %vm940_vm6, %v2533_v37, 0.0 }
 0x4d5   : > { %1060 = vadd.xlane.f32.xlu0 %v1059_v38 }
 0x4eb   : > { %1066 = vrot.lane.b32.xlu0 %v3193_v1, %s2815_s23  ;;  %s1947_s23 = sshll.u32 %s564_s11, 4  ;;  %s3336_s23 = int_to_ptr.vmem [resolvable:$true] %s1947_s23 }
 0x4ec   : > { %p2727_p0 = scmp.lt.s32.totalorder %s3336_s23, %s2725_s24 }
 0x4ef   : > { %v949_v39 = vpop.xlane.xlu0 %948  ;;  %1227 = vrot.lane.b32.xlu0 %v3195_v5, %s2816_s6 }
 0x4f0   : > { %2534 = vrcp.f32 %v949_v39 }
 0x4fa   : > { %v2535_v40 = vpop.eup %2534 }
 0x4fb   : > { %v951_v41 = vmul.f32 %v2535_v40, %v2531_v32  ;;  %v2483_v40 = vld [vmem:[#allocation8 + $0x28] sm:$0xff]  }
 0x4fd   : > { %v952_v42 = vpack.c.bf16 %v951_v41, %v951_v41 }
 0x4ff   : > { %2266 = vmatmul.mubr.msk.bf16.vlgmr.msra.gmra.mrb[4].mxu1 %vm940_vm6, %v952_v42 }
 0x500   : > { %2277 = vmatprep.mubr.msk.bf16.mxu1 %vm2814_vm0, %v2812_v8 }
 0x562   : > { %v1061_v45 = vpop.xlane.xlu0 %1060 }
 0x563   : > { %2536 = vrcp.f32 %v1061_v45 }
 0x566   : > { %v1067_v46 = vpop.permute.xlu0 %1066 }
 0x567   : > { %v1072_v49 = vsel %vm956_vm3, %v1067_v46, 0 }
 0x568   : > { %2276 = vmatpush3.bf16.msra.mxu1 %v1072_v49 }
 0x569   : > { %2289 = vmatprep.subr.bf16.mxu1 %v2812_v8 }
 0x56a   : > { %v1228_v61 = vpop.permute.xlu0 %1227 }
 0x56b   : > { %v1233_v4 = vsel %vm893_vm4, %v1228_v61, 0  ;;  %v2484_v61 = vld [vmem:[#allocation8 + $0x30] sm:$0xff]  }
 0x56d   : > { %v2537_v50 = vpop.eup %2536 }
 0x56e   : > { %v1063_v52 = vmul.f32 %v2537_v50, %v2533_v37 }
 0x570   : > { %v1064_v54 = vpack.c.bf16 %v1063_v52, %v1063_v52 }
 0x572   : > { %2278 = vmatmul.mubr.msk.bf16.vlgmr.msra.gmra.mrb[8].mxu1 %vm940_vm6, %v1064_v54 }
 0x573   : > { %2290 = vmatpush3.bf16.msra.mxu1 %v2478_v53  ;;  %2293 = vmatprep.mubr.msk.bf16.mxu1 %vm2814_vm0, %v2812_v8 }
 0x574   : > { %2291 = vmatprep.subr.bf16.mxu1 %v2812_v8 }
 0x577   : > { %2292 = vmatpush3.bf16.msra.mxu1 %v2479_v55 }
 0x578   : > { %2303 = vmatprep.subr.bf16.mxu1 %v2812_v8 }
 0x5d2   : > { %v994_v56 = vpop.f32.mrb[4].mxu1 }
 0x5d3   : > { %v1000_v57 = vpack.c.bf16 %v994_v56, %v994_v56  ;;  %v2267_v58 = vpop.f32.mrb[5].mxu1 }
 0x5d4   : > { %v997_v59 = vpop.f32.mrb[6].mxu1 }
 0x5d5   : > { %v2268_v60 = vpop.f32.mrb[7].mxu1  ;;  %2294 = vmatmul.mubr.msk.bf16.vlgmr.msra.gmra.mrb[12].mxu1 %vm893_vm4, %v1000_v57 }
 0x5d6   : > { %2305 = vmatprep.mubr.msk.bf16.mxu1 %vm2814_vm0, %v2812_v8 }
 0x645   : > { %v1108_v62 = vpop.f32.mrb[8].mxu1 }
 0x646   : > { %v1114_v63 = vpack.c.bf16 %v1108_v62, %v1108_v62  ;;  %v2279_v2 = vpop.f32.mrb[9].mxu1 }
 0x647   : > { %v1111_v3 = vpop.f32.mrb[10].mxu1 }
 0x648   : > { %v2280_v6 = vpop.f32.mrb[11].mxu1  ;;  %2286 = vmatmul.mubr.msk.bf16.vlgmr.msra.gmra.mrb[12].mxu0 %vm893_vm4, %v1114_v63 }
 0x649   : > { %2298 = vmatpush3.bf16.xpose.msra.mxu0 %v1233_v4  ;;  %2299 = vmatprep.mubr.msk.bf16.mxu0 %vm2814_vm0, %v2812_v8 }
 0x64a   : > { %2309 = vmatprep.subr.bf16.mxu0 %v2812_v8 }
 0x650   : > { %2300 = vmatmul.mubr.msk.bf16.vlgmr.msra.gmra.mrb[16].mxu0 %vm893_vm4, %v1226_v7 }
 0x651   : > { %2313 = vmatprep.mubr.msk.bf16.mxu0 %vm2814_vm0, %v2812_v8  ;;  %2310 = vmatpush3.bf16.msra.mxu0 %v2482_v34  ;;  %v2497_v34 = vld [vmem:[#allocation10 + $0x34] ss:$8 sps:$4 sm:$0xff]  }
 0x652   : > { %2311 = vmatprep.subr.bf16.mxu0 %v2812_v8 }
 0x655   : > { %2312 = vmatpush3.bf16.msra.mxu0 %v2483_v40  ;;  %v2509_v40 = vld [vmem:[#allocation10 + $0x74] ss:$8 sps:$4 sm:$0xff]  }
 0x656   : > { %2323 = vmatprep.subr.bf16.mxu0 %v2812_v8 }
 0x6a8   : > { %v1219_v10 = vpop.f32.mrb[12].mxu1 }
 0x6a9   : > { %v2295_v11 = vpop.f32.mrb[13].mxu1 }
 0x6aa   : > { %v1222_v12 = vpop.f32.mrb[14].mxu1  ;;  %v2485_v11 = vld [vmem:[#allocation8 + $0x38] sm:$0xff]  }
 0x6ab   : > { %v2296_v13 = vpop.f32.mrb[15].mxu1 }
 0x71b   : > { %v1164_v14 = vpop.f32.mrb[12].mxu0 }
 0x71c   : > { %v3262_v16 = vadd.f32 %v1219_v10, %v1164_v14  ;;  %v2287_v17 = vpop.f32.mrb[13].mxu0 }
 0x71d   : > { %v1167_v18 = vpop.f32.mrb[14].mxu0 }
 0x71e   : > { %v2288_v19 = vpop.f32.mrb[15].mxu0 }
 0x723   : > { %v1269_v20 = vpop.f32.mrb[16].mxu0 }
 0x724   : > { %v1270_v21 = vadd.f32 %v1269_v20, %v3225_v15  ;;  %v2301_v23 = vpop.f32.mrb[17].mxu0 }
 0x725   : > { %v1272_v24 = vpop.f32.mrb[18].mxu0 }
 0x726   : > { %v2302_v25 = vpop.f32.mrb[19].mxu0  ;;  %v1275_v26 = vsel %vm940_vm6, %v1270_v21, -inf }
 0x727   : > { %1276 = vmax.xlane.f32.xlu0 %v1275_v26 }
 0x73d   : > { %1287 = vrot.lane.b32.xlu0 %v3193_v1, %s2816_s6  ;;  %s3425_s6 = sld [smem:[#allocation22_spill]] }
 0x741   : > { %1392 = vrot.lane.b32.xlu0 %v3204_v9, %s2817_s26 }
 0x7b4   : > { %v1277_v27 = vpop.xlane.xlu0 %1276 }
 0x7b5   : > { %v1278_v28 = vsub.f32 %v1270_v21, %v1277_v27  ;;  %v2138_v21 = vld [vmem:[%s3385_s7] ss:$0 sm:$0xff] }
 0x7b7   : > { %v1279_v29 = vmul.f32 1.442695, %v1278_v28 }
 0x7b8   : > { %v1288_v30 = vpop.permute.xlu0 %1287 }
 0x7b9   : > { %2538 = vpow2.f32 %v1279_v29  ;;  %v1293_v31 = vsel %vm956_vm3, %v1288_v30, 0  ;;  %v2488_v29 = vld [vmem:[#allocation10 + $0x4] ss:$8 sps:$4 sm:$0xff]   ;;  %v2486_v30 = vld [vmem:[#allocation10] ss:$8 sps:$4 sm:$0xff]  }
 0x7ba   : > { %2304 = vmatpush3.bf16.msra.mxu1 %v1293_v31  ;;  %v2491_v31 = vld [vmem:[#allocation10 + $0x14] ss:$8 sps:$4 sm:$0xff]  }
 0x7bb   : > { %2317 = vmatprep.subr.bf16.mxu1 %v2812_v8 }
 0x7c3   : > { %v2539_v32 = vpop.eup %2538 }
 0x7c4   : > { %v1281_v33 = vsel %vm940_vm6, %v2539_v32, 0.0 }
 0x7c5   : > { %1282 = vadd.xlane.f32.xlu1 %v1281_v33  ;;  %v2492_v33 = vld [vmem:[#allocation10 + $0x20] ss:$8 sps:$4 sm:$0xff]  }
 0x7d6   : > { %1394 = vrot.lane.b32.xlu1 %v3195_v5, %s2817_s26  ;;  %v1393_v5 = vpop.permute.xlu0 %1392 }
 0x852   : > { %v1283_v9 = vpop.xlane.xlu1 %1282 }
 0x853   : > { %2540 = vrcp.f32 %v1283_v9  ;;  %v2495_v9 = vld [vmem:[#allocation10 + $0x30] ss:$8 sps:$4 sm:$0xff]  }
 0x856   : > { %v1395_v37 = vpop.permute.xlu1 %1394 }
 0x857   : > { %v1400_v39 = vsel %vm893_vm4, %v1395_v37, 0  ;;  %v2503_v37 = vld [vmem:[#allocation10 + $0x54] ss:$8 sps:$4 sm:$0xff]  }
 0x85d   : > { %v2541_v35 = vpop.eup %2540 }
 0x85e   : > { %v1285_v36 = vmul.f32 %v2541_v35, %v2539_v32  ;;  %v2494_v32 = vld [vmem:[#allocation10 + $0x24] ss:$8 sps:$4 sm:$0xff]   ;;  %v2498_v35 = vld [vmem:[#allocation10 + $0x40] ss:$8 sps:$4 sm:$0xff]  }
 0x860   : > { %v1286_v38 = vpack.c.bf16 %v1285_v36, %v1285_v36  ;;  %v2500_v36 = vld [vmem:[#allocation10 + $0x44] ss:$8 sps:$4 sm:$0xff]  }
 0x862   : > { %2306 = vmatmul.mubr.msk.bf16.vlgmr.msra.gmra.mrb[16].mxu1 %vm940_vm6, %v1286_v38  ;;  %v2501_v38 = vld [vmem:[#allocation10 + $0x50] ss:$8 sps:$4 sm:$0xff]  }
 0x863   : > { %2318 = vmatpush3.bf16.xpose.msra.mxu1 %v1400_v39  ;;  %2319 = vmatprep.mubr.msk.bf16.mxu1 %vm2814_vm0, %v2812_v8  ;;  %v2506_v39 = vld [vmem:[#allocation10 + $0x64] ss:$8 sps:$4 sm:$0xff]  }
 0x864   : > { %2329 = vmatprep.subr.bf16.mxu1 %v2812_v8 }
 0x86a   : > { %2320 = vmatmul.mubr.msk.bf16.vlgmr.msra.gmra.mrb[20].mxu1 %vm893_vm4, %v1393_v5  ;;  %v2504_v5 = vld [vmem:[#allocation10 + $0x60] ss:$8 sps:$4 sm:$0xff]  }
 0x86b   : > { %2333 = vmatprep.mubr.msk.bf16.mxu1 %vm2814_vm0, %v2812_v8  ;;  %2330 = vmatpush3.bf16.msra.mxu1 %v2484_v61 }
 0x86c   : > { %2331 = vmatprep.subr.bf16.mxu1 %v2812_v8 }
 0x86f   : > { %2332 = vmatpush3.bf16.msra.mxu1 %v2485_v11  ;;  %v2522_v11 = vld [vmem:[#allocation11 + $0x70] sm:$0xff]  }
 0x935   : > { %v1329_v41 = vpop.f32.mrb[16].mxu1 }
 0x936   : > { %v1335_v42 = vpack.c.bf16 %v1329_v41, %v1329_v41  ;;  %v2307_v43 = vpop.f32.mrb[17].mxu1  ;;  %v2507_v41 = vld [vmem:[#allocation10 + $0x70] ss:$8 sps:$4 sm:$0xff]  }
 0x937   : > { %v1332_v44 = vpop.f32.mrb[18].mxu1  ;;  %v2511_v43 = vld [vmem:[#allocation11] sm:$0xff]  }
 0x938   : > { %v2308_v45 = vpop.f32.mrb[19].mxu1  ;;  %2314 = vmatmul.mubr.msk.bf16.vlgmr.msra.gmra.mrb[20].mxu0 %vm893_vm4, %v1335_v42  ;;  %v2510_v42 = vld [vmem:[#allocation11 + $0x40] sm:$0xff]   ;;  %v2512_v44 = vld [vmem:[#allocation11 + $0x48] sm:$0xff]  }
 0x939   : > { %2325 = vmatprep.mubr.msk.bf16.mxu0 %vm2814_vm0, %v2812_v8  ;;  %2215 = vmatprep.subr.bf16.mxu1 %v2510_v42  ;;  %v2513_v45 = vld [vmem:[#allocation11 + $0x8] sm:$0xff]  }
 0x93d   : > { %v1436_v46 = vpop.f32.mrb[20].mxu1 }
 0x93e   : > { %v1437_v49 = vadd.f32 %v1436_v46, %v3225_v15  ;;  %v2321_v50 = vpop.f32.mrb[21].mxu1  ;;  %v2514_v46 = vld [vmem:[#allocation11 + $0x50] sm:$0xff]  }
 0x93f   : > { %v1439_v52 = vpop.f32.mrb[22].mxu1  ;;  %v2516_v50 = vld [vmem:[#allocation11 + $0x58] sm:$0xff]  }
 0x940   : > { %v2322_v53 = vpop.f32.mrb[23].mxu1  ;;  %v1442_v54 = vsel %vm940_vm6, %v1437_v49, -inf  ;;  %v2517_v52 = vld [vmem:[#allocation11 + $0x18] sm:$0xff]  }
 0x941   : > { %1443 = vmax.xlane.f32.xlu0 %v1442_v54  ;;  %v2518_v53 = vld [vmem:[#allocation11 + $0x60] sm:$0xff]  }
 0x942   : > { %v2519_v54 = vld [vmem:[#allocation11 + $0x20] sm:$0xff]  }
 0x957   : > { %1454 = vrot.lane.b32.xlu0 %v3193_v1, %s2817_s26  ;;  %s2720_s26 = scalar_lea.vmem %s3336_s23, 128 }
 0x958   : > { %p2721_p10 = scmp.ne.s32.totalorder %s3336_s23, %s2720_s26  ;;  %p2728_p2 = scmp.lt.s32.totalorder %s2726_s20, %s2720_s26 }
 0x95a   : > { %p2722_p1 = pnand %p2721_p10, %p3428_p4  ;;  %p2729_p3 = por %p2728_p2, %p2727_p0 }
 0x95c   : > { %p2723_p13 = pneg %p2722_p1 }
 0x95e   : > { %p2730_p6 = pnand %p2729_p3, %p2723_p13 }
 0x9ce   : > { %v1444_v55 = vpop.xlane.xlu0 %1443 }
 0x9cf   : > { %v1445_v56 = vsub.f32 %v1437_v49, %v1444_v55  ;;  %v2515_v49 = vld [vmem:[#allocation11 + $0x10] sm:$0xff]   ;;  %v2520_v55 = vld [vmem:[#allocation11 + $0x68] sm:$0xff]  }
 0x9d1   : > { %v1446_v57 = vmul.f32 1.442695, %v1445_v56  ;;  %v2521_v56 = vld [vmem:[#allocation11 + $0x28] sm:$0xff]  }
 0x9d2   : > { %v1455_v58 = vpop.permute.xlu0 %1454 }
 0x9d3   : > { %2542 = vpow2.f32 %v1446_v57  ;;  %v1460_v59 = vsel %vm956_vm3, %v1455_v58, 0 }
 0x9d4   : > { %2324 = vmatpush3.bf16.msra.mxu0 %v1460_v59 }
 0x9d5   : > { %1711 = vmatprep.subr.bf16.mxu0 %v2488_v29 }
 0x9dd   : > { %v2543_v60 = vpop.eup %2542 }
 0x9de   : > { %v1448_v15 = vsel %vm940_vm6, %v2543_v60, 0.0 }
 0x9df   : > { %1449 = vadd.xlane.f32.xlu1 %v1448_v15 }
 0xa0b   : > { %v1385_v62 = vpop.f32.mrb[20].mxu0 }
 0xa0c   : > { %v1391_v63 = vadd.f32 %v1385_v62, %v3262_v16  ;;  %v2315_v1 = vpop.f32.mrb[21].mxu0 }
 0xa0d   : > { %v1388_v2 = vpop.f32.mrb[22].mxu0  ;;  %v2139_v1 = vld [vmem:[%s3386_s8] ss:$0 sm:$0xff] }
 0xa0e   : > { %v2316_v3 = vpop.f32.mrb[23].mxu0 }
 0xa6c   : > { %v1450_v4 = vpop.xlane.xlu1 %1449 }
 0xa6d   : > { %2544 = vrcp.f32 %v1450_v4  ;;  %v2140_v4 = vld [vmem:[%s3424_s25] ss:$0 sm:$0xff] }
 0xa77   : > { %v2545_v6 = vpop.eup %2544 }
 0xa78   : > { %v1452_v7 = vmul.f32 %v2545_v6, %v2543_v60 }
 0xa7a   : > { %v1453_v10 = vpack.c.bf16 %v1452_v7, %v1452_v7 }
 0xa7c   : > { %2326 = vmatmul.mubr.msk.bf16.vlgmr.msra.gmra.mrb[24].mxu0 %vm940_vm6, %v1453_v10 }
 0xa7d   : > { %1743 = vmatprep.mubr.bf16.mxu0 %v2813_v22  ;;  %1712 = vmatpush1.bf16.msra.mxu0 %v2486_v30 }
 0xa7e   : > { %1713 = vmatprep.subr.bf16.mxu0 %v2491_v31 }
 0xb4f   : > { %v1496_v12 = vpop.f32.mrb[24].mxu0 }
 0xb50   : > { %v1502_v13 = vpack.c.bf16 %v1496_v12, %v1496_v12  ;;  %v2327_v8 = vpop.f32.mrb[25].mxu0  ;;  %v2523_v12 = vld [vmem:[#allocation11 + $0x30] sm:$0xff]  }
 0xb51   : > { %v1499_v14 = vpop.f32.mrb[26].mxu0  ;;  %v2525_v8 = vld [vmem:[#allocation11 + $0x38] sm:$0xff]  }
 0xb52   : > { %v2328_v17 = vpop.f32.mrb[27].mxu0  ;;  %2334 = vmatmul.mubr.msk.bf16.vlgmr.msra.gmra.mrb[24].mxu1 %vm893_vm4, %v1502_v13  ;;  %v2524_v13 = vld [vmem:[#allocation11 + $0x78] sm:$0xff]   ;;  %v1619_v14 = vld [vmem:[%s3425_s6] sm:$0x3]  ;;  %s1934_s6 = scalar_lea.sflag [#allocation4], %s3129_s28 }
 0xb53   : > { %2216 = vmatpush3.bf16.msra.mxu1 %v2511_v43  ;;  %v1624_v17 = vrot.slane %v1619_v14, %v3183_v48 }
 0xb54   : > { %2217 = vmatprep.subr.bf16.mxu1 %v2512_v44 }
 0xb57   : > { %2218 = vmatpush3.bf16.msra.mxu1 %v2513_v45 }
 0xb58   : > { %2219 = vmatprep.subr.bf16.mxu1 %v2514_v46 }
 0xb5b   : > { %2220 = vmatpush3.bf16.msra.mxu1 %v2515_v49 }
 0xb5c   : > { %2221 = vmatprep.subr.bf16.mxu1 %v2516_v50 }
 0xb5f   : > { %2222 = vmatpush3.bf16.msra.mxu1 %v2517_v52 }
 0xb60   : > { %2223 = vmatprep.subr.bf16.mxu1 %v2518_v53 }
 0xb63   : > { %2224 = vmatpush3.bf16.msra.mxu1 %v2519_v54 }
 0xb64   : > { %2225 = vmatprep.subr.bf16.mxu1 %v2520_v55 }
 0xb67   : > { %2226 = vmatpush3.bf16.msra.mxu1 %v2521_v56 }
 0xb68   : > { %2227 = vmatprep.subr.bf16.mxu1 %v2522_v11 }
 0xb6b   : > { %2228 = vmatpush3.bf16.msra.mxu1 %v2523_v12 }
 0xb6c   : > { %2229 = vmatprep.subr.bf16.mxu1 %v2524_v13 }
 0xb6f   : > { %2230 = vmatpush3.bf16.msra.mxu1 %v2525_v8 }
 0xc25   : > { %v1552_v16 = vpop.f32.mrb[24].mxu1 }
 0xc26   : > { %v1558_v18 = vadd.f32 %v1552_v16, %v1391_v63  ;;  %v2335_v19 = vpop.f32.mrb[25].mxu1  ;;  %v1628_v16 = vrot.slane %v1619_v14, %v647_v51 }
 0xc27   : > { %v1555_v20 = vpop.f32.mrb[26].mxu1 }
 0xc28   : > { %v1559_v23 = vadd.f32 %v1558_v18, %v3151_v0  ;;  %v2336_v22 = vpop.f32.mrb[27].mxu1  ;;  %v2489_v0 = vld [vmem:[#allocation10 + $0x10] ss:$8 sps:$4 sm:$0xff]  }
 0xc29   : > { %1714 = vmatpush1.bf16.msra.mxu0 %v2489_v0 }
 0xc2a   : > { %v3303_v24 = vadd.f32 %v2138_v21, %v1559_v23  ;;  %1715 = vmatprep.subr.bf16.mxu0 %v2494_v32 }
 0xc2c   : > { %1570 = vadd.xlane.f32.xlu1 %v3303_v24 }
 0xc2d   : > { %1716 = vmatpush1.bf16.msra.mxu0 %v2492_v33 }
 0xc2e   : > { %1717 = vmatprep.subr.bf16.mxu0 %v2497_v34 }
 0xc31   : > { %1718 = vmatpush1.bf16.msra.mxu0 %v2495_v9 }
 0xc32   : > { %1719 = vmatprep.subr.bf16.mxu0 %v2500_v36 }
 0xc35   : > { %1720 = vmatpush1.bf16.msra.mxu0 %v2498_v35 }
 0xc36   : > { %1721 = vmatprep.subr.bf16.mxu0 %v2503_v37 }
 0xc39   : > { %1722 = vmatpush1.bf16.msra.mxu0 %v2501_v38 }
 0xc3a   : > { %1723 = vmatprep.subr.bf16.mxu0 %v2506_v39 }
 0xc3d   : > { %1724 = vmatpush1.bf16.msra.mxu0 %v2504_v5 }
 0xc3e   : > { %1725 = vmatprep.subr.bf16.mxu0 %v2509_v40 }
 0xc41   : > { %1726 = vmatpush1.bf16.msra.mxu0 %v2507_v41 }
 0xcb9   : > { %v1571_v25 = vpop.xlane.xlu1 %1570 }
 0xcba   : > { %v1572_v26 = vmul.f32 0.0078125, %v1571_v25 }
 0xcbc   : > { %v3307_v27 = vsub.f32 %v3303_v24, %v1572_v26 }
 0xcbe   : > { %v1574_v28 = vmul.f32 %v3307_v27, %v3307_v27  ;;  %v1593_v2 = vmul.f32 %v2139_v1, %v3307_v27 }
 0xcc0   : > { %1575 = vadd.xlane.f32.xlu1 %v1574_v28 }
 0xd4d   : > { %v1576_v57 = vpop.xlane.xlu1 %1575 }
 0xd4e   : > { %v1577_v58 = vmul.f32 0.007874016, %v1576_v57 }
 0xd50   : > { %2546 = vrsqrt.f32 %v1577_v58  ;;  %vm1580_vm7 = vcmp.eq.f32.partialorder %v1577_v58, inf  ;;  %v1583_v15 = vand.u32 2147483648, %v1577_v58  ;;  %vm1582_vm8 = vcmp.eq.f32.partialorder %v1577_v58, 0.0 }
 0xd5a   : > { %v2547_v59 = vpop.eup %2546 }
 0xd5b   : > { %v1579_v60 = vmul.f32 %v2547_v59, %v1577_v58 }
 0xd5d   : > { %v1581_v61 = vsel %vm1580_vm7, %v1577_v58, %v1579_v60 }
 0xd5e   : > { %v1584_v62 = vsel %vm1582_vm8, %v1583_v15, %v1581_v61 }
 0xd5f   : > { %v1585_v63 = vadd.f32 1e-06, %v1584_v62 }
 0xd61   : > { %2548 = vrcp.f32 %v1585_v63 }
 0xd6b   : > { %v2549_v3 = vpop.eup %2548 }
 0xd6c   : > { %v1594_v6 = vmul.f32 %v2549_v3, %v1593_v2 }
 0xd6e   : > { %v1601_v7 = vadd.f32 %v2140_v4, %v1594_v6 }
 0xd70   : > { %v1602_v10 = vpack.c.bf16 %v1601_v7, %v1601_v7 }
 0xd72   : > { %1744 = vmatmul.mubr.bf16.vlgmr.msra.gmra.mrb[28].mxu0 %v1602_v10 }
 0xe45   : > { %v1745_v18 = vpop.f32.mrb[28].mxu0 }
 0xe46   : > { %v1746_v19 = vadd.f32 %v1745_v18, %v1624_v17  ;;  %v1747_v20 = vpop.f32.mrb[29].mxu0 }
 0xe47   : > { %v1748_v21 = vadd.f32 %v1747_v20, %v1628_v16  ;;  %v1749_v23 = vpop.f32.mrb[30].mxu0 }
 0xe48   : > { %v1752_v22 = vmax.f32 %v1746_v19, 0.0  ;;  %v1750_v25 = vpop.f32.mrb[31].mxu0 }
 0xe49   : > { %v1753_v26 = vmax.f32 %v1748_v21, 0.0 }
 0xe4a   : > { %v1754_v28 = vpack.c.bf16 %v1752_v22, %v1752_v22 }
 0xe4b   : > { %v1755_v27 = vpack.c.bf16 %v1753_v26, %v1753_v26 }
 0xe4d   : > { %1923 = vmatprep.mubr.bf16.mxu1 %v1755_v27 }
 0xe4e   : > { %1924 = vmatmul.mubr.bf16.vlgmr.msra.gmra.mrb[28].mxu1 %v1754_v28 }
 0xf21   : > { %v2231_v29 = vpop.f32.mrb[28].mxu1 }
 0xf22   : > { %v2232_v48 = vpop.f32.mrb[29].mxu1 }
 0xf23   : > { %v2233_v51 = vadd.f32 %v2232_v48, %v2231_v29  ;;  %v2234_v30 = vpop.f32.mrb[30].mxu1 }
 0xf24   : > { %v2235_v31 = vpop.f32.mrb[31].mxu1 }
 0xf25   : > { %v1926_v0 = vadd.f32 %v2233_v51, %v2157_v47 }
 0xf27   : > { %v1931_v32 = vadd.f32 %v1926_v0, %v3303_v24 }
 0xf29   : > { %1932 = vst [vmem:[%s564_s11] sm:$0xff] %v1931_v32 }
 0xf2a   : > { %2733 = shalt.err (!%p2730_p6)
}
 0xf2b   : > { %s2734_s28 = scalar_lea.hbm %s3334_s9, 128  ;;  %s2738_s11 = scalar_lea.hbm %s3427_s22, 256 }
 0xf2c   : > { %p2735_p11 = scmp.ne.s32.totalorder %s3334_s9, %s2734_s28  ;;  %p2739_p5 = scmp.lt.u32.totalorder %s3334_s9, %s3427_s22 }
 0xf2d   : > { %p2740_p9 = scmp.lt.u32.totalorder %s2738_s11, %s2734_s28  ;;  %p2742_p10 = scmp.lt.u32.totalorder %s2734_s28, %s3334_s9 }
 0xf2e   : > { %p2736_p12 = pnand %p2735_p11, %p3428_p4 }
 0xf2f   : > { %p2741_p7 = por %p2740_p9, %p2739_p5 }
 0xf30   : > { %p2737_p8 = pneg %p2736_p12 }
 0xf31   : > { %p2743_p1 = por %p2742_p10, %p2741_p7 }
 0xf33   : > { %p2744_p13 = pnand %p2743_p1, %p2737_p8 }
 0xf35   : > { %2747 = shalt.err (!%p2744_p13)
}
 0xf36   : > { %2359 = dma.vmem_to_hbm [thread:$0]  (%p3428_p4), %s3336_s23, 128, %s3334_s9, %s1934_s6  }
 0xf37 PF: > { %s1959_s26 = sand.u32 1, %s2786_s29   ;;  %p3429_p0 = scmp.ne.s32.totalorder %s3415_s18, 0 }
 0xf38   : > { %p3430_p2 = scmp.ge.s32.totalorder %s2798_s16, 2  ;;  %s1960_s19 = scalar_lea.sflag [#allocation4], %s1959_s26 }
 0xf3a   : > { %p2382_p3 = pnand %p3430_p2, %p3429_p0 }
 0xf3c   : > { %2781 = dma.done.wait (!%p2382_p3), %s1960_s19, 128  }
 0xf3d   : > { %2783 = vsyncadd (!%p2382_p3), %s1960_s19, 4294967168  ;;  %p30_p6 = scmp.ge.s32.totalorder %s3059_s21, 4   ;;  %s3431_s29 = smov %s2790_s30 }
 0xf3e   : > { %s3432_s30 = smov %s2794_s15  ;;  %s3433_s15 = smov %s3071_s17 }
 0xf3f   : > { %s3434_s16 = smov %s3059_s21  ;;  %32 = sbr.rel (!%p30_p6) target bundleno = 15 (0xf), region = 144 }
 0xf46   :  { %1965 = vsyncpa [#allocation3], 1 }
 0xf47   :  { %1967 = vsyncpa [#allocation3 + $0x1], 1 }
 0xf48   :  { %1968 = vsyncpa [#allocation6], 1 }
 0xf49   :  { %1969 = vsyncpa [#allocation9], 1 }
 0xf4a   :  { %1970 = vsyncpa [#allocation12], 1 }
 0xf4b   :  { %1971 = vsyncpa [#allocation4], 1 }
 0xf4c   :  { %1973 = vsyncpa [#allocation4 + $0x1], 1 }

</bundles_post_ra>
